<compile_context>
chip_gen: v6e
topology: v6e:2x2x1
jax: 0.10.0
libtpu: 0.0.40
codegen_flags: <defaults>
</compile_context>

<pallas_src>
import numpy as np

import jax
import jax.numpy as jnp
from jax.experimental import pallas as pl
from jax.experimental.pallas import tpu as pltpu


# ----------------------------- Pallas kernel ------------------------------- #

def _fused_encoder_kernel(x_ref, w1_ref, b1_ref, w2_ref, b2_ref,
                          w3_ref, b3_ref, o_ref):
    """z = leaky(leaky(x@W1+b1)@W2+b2)@W3 + b3 — everything stays in VMEM/vregs."""
    neg = jnp.float32(0.01)  # nn.LeakyReLU() default negative_slope

    h = jnp.dot(x_ref[...], w1_ref[...], preferred_element_type=jnp.float32)
    h = h + b1_ref[...]
    h = jnp.where(h >= 0, h, neg * h)

    h = jnp.dot(h, w2_ref[...], preferred_element_type=jnp.float32)
    h = h + b2_ref[...]
    h = jnp.where(h >= 0, h, neg * h)

    z = jnp.dot(h, w3_ref[...], preferred_element_type=jnp.float32)
    z = z + b3_ref[...]
    # Final (bb, 32) store is the only HBM write; all other activations stay on-chip.
    o_ref[...] = z.astype(o_ref.dtype)


def _pick_batch_tile(n):
    """Batch tile + padded batch.  Small batches: one full-batch block (no padding path).
    Larger batches: 8-row (sublane-aligned) tiles so work splits across TensorCores;
    very large batches: 128-row tiles for full MXU rows and fewer grid steps."""
    if n <= 8:
        return n, n
    bb = 128 if n >= 256 else 8
    n_pad = ((n + bb - 1) // bb) * bb
    return bb, n_pad


def image_encoder_forward(x, dense_params):
    """x: (N, C, H, W) float32. dense_params = build_dense_params(...)."""
    w1, b1, w2, b2, w3, b3 = dense_params
    N = x.shape[0]
    D0, D1 = w1.shape
    D2 = w2.shape[1]
    DZ = w3.shape[1]

    # PyTorch `x.view(-1, C*H*W)` flatten order; reshape is metadata-only, no copy.
    x_flat = x.reshape(N, D0).astype(jnp.float32)

    bb, n_pad = _pick_batch_tile(N)
    if n_pad != N:
        x_flat = jnp.pad(x_flat, ((0, n_pad - N), (0, 0)))
    grid = (n_pad // bb,)

    const = lambda i: (0, 0)  # weights/biases: same block every step -> DMA'd once

    z = pl.pallas_call(
        _fused_encoder_kernel,
        out_shape=jax.ShapeDtypeStruct((n_pad, DZ), jnp.float32),
        grid=grid,
        in_specs=[
            pl.BlockSpec((bb, D0), lambda i: (i, 0)),   # activations tile
            pl.BlockSpec((D0, D1), const),              # conv1 as dense matrix
            pl.BlockSpec((1, D1), const),
            pl.BlockSpec((D1, D2), const),              # conv2 as dense matrix
            pl.BlockSpec((1, D2), const),
            pl.BlockSpec((D2, DZ), const),              # latent Linear
            pl.BlockSpec((1, DZ), const),
        ],
        out_specs=pl.BlockSpec((bb, DZ), lambda i: (i, 0)),
        compiler_params=pltpu.CompilerParams(
            dimension_semantics=("parallel",)),
    )(x_flat, w1, b1, w2, b2, w3, b3)

    return z[:N] if n_pad != N else z


# ------------------- one-time parameter folding (init) --------------------- #

def conv_as_dense(w, b, hi, wi):
    """Fold Conv2d(Cin->Cout, k=3, stride=2, pad=1) into a dense matrix.

    Input columns  : flatten order (c, h, w)   -> length Cin*hi*wi
    Output columns : flatten order (f, ho, wo) -> length Cout*ho*wo
    (both match PyTorch's x.view(-1, C*H*W) ordering, so layers chain with no
    layout ops and the final flatten before the latent Linear is free).
    Zero padding is handled by dropping out-of-range taps.
    """
    w = np.asarray(w, np.float32)
    b = np.asarray(b, np.float32)
    cout, cin, k, _ = w.shape
    ho, wo = hi // 2, wi // 2
    big = np.zeros((cin * hi * wi, cout * ho * wo), np.float32)
    oy = np.arange(ho)
    ox = np.arange(wo)
    for kh in range(k):
        for kw in range(k):
            iy = 2 * oy + kh - 1          # input rows touched by this tap
            ix = 2 * ox + kw - 1          # input cols touched by this tap
            my = (iy >= 0) & (iy < hi)
            mx = (ix >= 0) & (ix < wi)
            if not (my.any() and mx.any()):
                continue
            in_sp = (iy[my][:, None] * wi + ix[mx][None, :]).ravel()
            out_sp = (oy[my][:, None] * wo + ox[mx][None, :]).ravel()
            for c in range(cin):
                for f in range(cout):
                    big[c * hi * wi + in_sp, f * ho * wo + out_sp] = w[f, c, kh, kw]
    b_big = np.repeat(b, ho * wo)         # bias broadcast over (ho, wo)
    return big, b_big


def build_dense_params(params, image_shape):
    """Precompute (once) the dense layer matrices consumed by the fused kernel."""
    _, H, W = image_shape
    hi, wi = H, W
    dense = []
    for (w, b) in params["conv"]:
        big, b_big = conv_as_dense(w, b, hi, wi)
        dense.append(jnp.asarray(big))
        dense.append(jnp.asarray(b_big).reshape(1, -1))
        hi, wi = hi // 2, wi // 2
    w_lat, b_lat = params["latent"]
    dense.append(jnp.asarray(w_lat, jnp.float32))
    dense.append(jnp.asarray(b_lat, jnp.float32).reshape(1, -1))
    return tuple(dense)


# --------------------------- deterministic params --------------------------- #

def init_params(key, image_shape, conv_filters, latent_dim):
    C, H, W = image_shape
    params = {"conv": []}
    in_feat, curr = C, (C, H, W)
    for feats in conv_filters:
        key, k1, k2 = jax.random.split(key, 3)
        w = jax.random.normal(k1, (feats, in_feat, 3, 3), jnp.float32) * 0.1
        b = jax.random.normal(k2, (feats,), jnp.float32) * 0.1
        params["conv"].append((w, b))
        in_feat = feats
        curr = (in_feat, curr[1] // 2, curr[2] // 2)
    flat_dim = curr[0] * curr[1] * curr[2]
    key, k1, k2 = jax.random.split(key, 3)
    w_lat = jax.random.normal(k1, (flat_dim, latent_dim), jnp.float32) * 0.05
    b_lat = jax.random.normal(k2, (latent_dim,), jnp.float32) * 0.05
    params["latent"] = (w_lat, b_lat)
    return params, curr


# ------------------------- plain-JAX reference check ------------------------ #

def reference_forward(x, params):
    """Direct NCHW conv reference (same semantics as the PyTorch module)."""
    h = x
    for (w, b) in params["conv"]:
        h = jax.lax.conv_general_dilated(
            h, w, window_strides=(2, 2), padding=((1, 1), (1, 1)),
            dimension_numbers=("NCHW", "OIHW", "NCHW"),
            precision=jax.lax.Precision.HIGHEST)
        h = h + b[None, :, None, None]
        h = jnp.where(h >= 0, h, 0.01 * h)
    flat = h.reshape(h.shape[0], -1)        # x.view(-1, prod(last_shape)), (C,H,W) order
    w_lat, b_lat = params["latent"]
    return jnp.dot(flat, w_lat, precision=jax.lax.Precision.HIGHEST) + b_lat


# ---------------------------------- main ------------------------------------ #

if __name__ == "__main__":
    image_shape = (4, 16, 16)        # (C, H, W)
    conv_filters = [8, 16]
    latent_dim = 32
    batch = 2

    key = jax.random.PRNGKey(0)
    key, kx = jax.random.split(key)
    x = jax.random.normal(kx, (batch,) + image_shape, jnp.float32)

    params, last_shape = init_params(key, image_shape, conv_filters, latent_dim)
    dense_params = build_dense_params(params, image_shape)

    z = image_encoder_forward(x, dense_params)
    z = jax.block_until_ready(z)

    assert z.shape == (batch, latent_dim), z.shape
    assert bool(jnp.all(jnp.isfinite(z)))

    # Correctness vs a direct strided-conv reference (same module semantics).
    z_ref = reference_forward(x, params)
    err = float(jnp.max(jnp.abs(z - z_ref)))
    assert err < 5e-3, f"max abs error vs reference: {err}"

    print("KERNEL_OK")
</pallas_src>

<mosaic_0001>
module attributes {stable_mosaic.version = 11 : i64} {
  func.func @_fused_encoder_kernel(%arg0: i32, %arg1: memref<2x1024xf32, #tpu.memory_space<vmem>>, %arg2: memref<1024x512xf32, #tpu.memory_space<vmem>>, %arg3: memref<1x512xf32, #tpu.memory_space<vmem>>, %arg4: memref<512x256xf32, #tpu.memory_space<vmem>>, %arg5: memref<1x256xf32, #tpu.memory_space<vmem>>, %arg6: memref<256x32xf32, #tpu.memory_space<vmem>>, %arg7: memref<1x32xf32, #tpu.memory_space<vmem>>, %arg8: memref<2x32xf32, #tpu.memory_space<vmem>>) attributes {dimension_semantics = [#tpu.dimension_semantics<parallel>], iteration_bounds = array<i64: 1>, scalar_prefetch = 0 : i64, scratch_operands = 0 : i64, tpu.core_type = #tpu.core_type<tc>, window_params = [{transform_indices = @transform_0, window_bounds = array<i64: 2, 1024>}, {pipeline_mode = #tpu.pipeline_mode<synchronous>, transform_indices = @transform_1, window_bounds = array<i64: 1024, 512>}, {pipeline_mode = #tpu.pipeline_mode<synchronous>, transform_indices = @transform_2, window_bounds = array<i64: 1, 512>}, {pipeline_mode = #tpu.pipeline_mode<synchronous>, transform_indices = @transform_3, window_bounds = array<i64: 512, 256>}, {pipeline_mode = #tpu.pipeline_mode<synchronous>, transform_indices = @transform_4, window_bounds = array<i64: 1, 256>}, {pipeline_mode = #tpu.pipeline_mode<synchronous>, transform_indices = @transform_5, window_bounds = array<i64: 256, 32>}, {pipeline_mode = #tpu.pipeline_mode<synchronous>, transform_indices = @transform_6, window_bounds = array<i64: 1, 32>}, {transform_indices = @transform_7, window_bounds = array<i64: 2, 32>}]} {
    %c0 = arith.constant 0 : index
    %c0_0 = arith.constant 0 : index
    %0 = vector.load %arg1[%c0, %c0_0] : memref<2x1024xf32, #tpu.memory_space<vmem>>, vector<2x1024xf32>
    %c0_1 = arith.constant 0 : index
    %c0_2 = arith.constant 0 : index
    %1 = vector.load %arg2[%c0_1, %c0_2] : memref<1024x512xf32, #tpu.memory_space<vmem>>, vector<1024x512xf32>
    %cst = arith.constant dense<0.000000e+00> : vector<2x512xf32>
    %2 = tpu.matmul %0, %1, %cst {dimension_numbers = #tpu.dot_dimension_numbers<[1], [0], [0], [1], [0, 0, 1, 1], [], []>} : vector<2x1024xf32>, vector<1024x512xf32>, vector<2x512xf32> -> vector<2x512xf32>
    %c0_3 = arith.constant 0 : index
    %c0_4 = arith.constant 0 : index
    %3 = vector.load %arg3[%c0_3, %c0_4] : memref<1x512xf32, #tpu.memory_space<vmem>>, vector<1x512xf32>
    %4 = vector.broadcast %3 : vector<1x512xf32> to vector<2x512xf32>
    %5 = arith.addf %2, %4 : vector<2x512xf32>
    %cst_5 = arith.constant 0.000000e+00 : f32
    %6 = vector.broadcast %cst_5 : f32 to vector<2x512xf32>
    %7 = arith.cmpf oge, %5, %6 : vector<2x512xf32>
    %cst_6 = arith.constant 0.00999999977 : f32
    %8 = vector.broadcast %cst_6 : f32 to vector<2x512xf32>
    %9 = arith.mulf %8, %5 : vector<2x512xf32>
    %10 = arith.select %7, %5, %9 : vector<2x512xi1>, vector<2x512xf32>
    %c0_7 = arith.constant 0 : index
    %c0_8 = arith.constant 0 : index
    %11 = vector.load %arg4[%c0_7, %c0_8] : memref<512x256xf32, #tpu.memory_space<vmem>>, vector<512x256xf32>
    %cst_9 = arith.constant dense<0.000000e+00> : vector<2x256xf32>
    %12 = tpu.matmul %10, %11, %cst_9 {dimension_numbers = #tpu.dot_dimension_numbers<[1], [0], [0], [1], [0, 0, 1, 1], [], []>} : vector<2x512xf32>, vector<512x256xf32>, vector<2x256xf32> -> vector<2x256xf32>
    %c0_10 = arith.constant 0 : index
    %c0_11 = arith.constant 0 : index
    %13 = vector.load %arg5[%c0_10, %c0_11] : memref<1x256xf32, #tpu.memory_space<vmem>>, vector<1x256xf32>
    %14 = vector.broadcast %13 : vector<1x256xf32> to vector<2x256xf32>
    %15 = arith.addf %12, %14 : vector<2x256xf32>
    %cst_12 = arith.constant 0.000000e+00 : f32
    %16 = vector.broadcast %cst_12 : f32 to vector<2x256xf32>
    %17 = arith.cmpf oge, %15, %16 : vector<2x256xf32>
    %cst_13 = arith.constant 0.00999999977 : f32
    %18 = vector.broadcast %cst_13 : f32 to vector<2x256xf32>
    %19 = arith.mulf %18, %15 : vector<2x256xf32>
    %20 = arith.select %17, %15, %19 : vector<2x256xi1>, vector<2x256xf32>
    %c0_14 = arith.constant 0 : index
    %c0_15 = arith.constant 0 : index
    %21 = vector.load %arg6[%c0_14, %c0_15] : memref<256x32xf32, #tpu.memory_space<vmem>>, vector<256x32xf32>
    %cst_16 = arith.constant dense<0.000000e+00> : vector<2x32xf32>
    %22 = tpu.matmul %20, %21, %cst_16 {dimension_numbers = #tpu.dot_dimension_numbers<[1], [0], [0], [1], [0, 0, 1, 1], [], []>} : vector<2x256xf32>, vector<256x32xf32>, vector<2x32xf32> -> vector<2x32xf32>
    %c0_17 = arith.constant 0 : index
    %c0_18 = arith.constant 0 : index
    %23 = vector.load %arg7[%c0_17, %c0_18] : memref<1x32xf32, #tpu.memory_space<vmem>>, vector<1x32xf32>
    %24 = vector.broadcast %23 : vector<1x32xf32> to vector<2x32xf32>
    %25 = arith.addf %22, %24 : vector<2x32xf32>
    %c0_19 = arith.constant 0 : index
    %c0_20 = arith.constant 0 : index
    %26 = vector.load %arg8[%c0_19, %c0_20] : memref<2x32xf32, #tpu.memory_space<vmem>>, vector<2x32xf32>
    tpu.vector_store %arg8[%c0_19, %c0_20], %25 {strides = array<i32>} : memref<2x32xf32, #tpu.memory_space<vmem>>, vector<2x32xf32>,
    return
  }
  func.func @transform_0(%arg0: i32) -> (i32, i32) {
    %c0_i32 = arith.constant 0 : i32
    %c0_i32_0 = arith.constant 0 : i32
    return %arg0, %c0_i32 : i32, i32
  }
  func.func @transform_1(%arg0: i32) -> (i32, i32) {
    %c0_i32 = arith.constant 0 : i32
    %c0_i32_0 = arith.constant 0 : i32
    %c0_i32_1 = arith.constant 0 : i32
    return %c0_i32, %c0_i32_0 : i32, i32
  }
  func.func @transform_2(%arg0: i32) -> (i32, i32) {
    %c0_i32 = arith.constant 0 : i32
    %c0_i32_0 = arith.constant 0 : i32
    %c0_i32_1 = arith.constant 0 : i32
    return %c0_i32, %c0_i32_0 : i32, i32
  }
  func.func @transform_3(%arg0: i32) -> (i32, i32) {
    %c0_i32 = arith.constant 0 : i32
    %c0_i32_0 = arith.constant 0 : i32
    %c0_i32_1 = arith.constant 0 : i32
    return %c0_i32, %c0_i32_0 : i32, i32
  }
  func.func @transform_4(%arg0: i32) -> (i32, i32) {
    %c0_i32 = arith.constant 0 : i32
    %c0_i32_0 = arith.constant 0 : i32
    %c0_i32_1 = arith.constant 0 : i32
    return %c0_i32, %c0_i32_0 : i32, i32
  }
  func.func @transform_5(%arg0: i32) -> (i32, i32) {
    %c0_i32 = arith.constant 0 : i32
    %c0_i32_0 = arith.constant 0 : i32
    %c0_i32_1 = arith.constant 0 : i32
    return %c0_i32, %c0_i32_0 : i32, i32
  }
  func.func @transform_6(%arg0: i32) -> (i32, i32) {
    %c0_i32 = arith.constant 0 : i32
    %c0_i32_0 = arith.constant 0 : i32
    %c0_i32_1 = arith.constant 0 : i32
    return %c0_i32, %c0_i32_0 : i32, i32
  }
  func.func @transform_7(%arg0: i32) -> (i32, i32) {
    %c0_i32 = arith.constant 0 : i32
    %c0_i32_0 = arith.constant 0 : i32
    return %arg0, %c0_i32 : i32, i32
  }
}

</mosaic_0001>

<bundles_post_ra>
// kernel: tpu_custom_call.1
= control target key start
LH: loop header
LB: loop body
LE: loop exit
PB: predicated region body
PF: predicated region fallthrough
CT: control target
= control target key end

     0   :  { %12 = vsyncpa [#allocation3], 0  ;;  %s2114_s0 = inlined_call_operand.hbm [shape: f32[2,1024], index: 0, kind: input, shape index: {}]   ;;  %s2115_s1 = inlined_call_operand.hbm [shape: f32[1024,512], index: 1, kind: input, shape index: {}]   ;;  %s2116_s2 = inlined_call_operand.hbm [shape: f32[1,512], index: 2, kind: input, shape index: {}]   ;;  %s2117_s3 = inlined_call_operand.hbm [shape: f32[512,256], index: 3, kind: input, shape index: {}]   ;;  %s2118_s4 = inlined_call_operand.hbm [shape: f32[1,256], index: 4, kind: input, shape index: {}]   ;;  %s2119_s5 = inlined_call_operand.vmem [shape: f32[256,32], index: 5, kind: input, shape index: {}]   ;;  %s2120_s6 = inlined_call_operand.hbm [shape: f32[1,32], index: 6, kind: input, shape index: {}]   ;;  %s2121_s7 = inlined_call_operand.hbm [shape: f32[2,32], index: 7, kind: output, shape index: {}]  }
   0x1   :  { %13 = vsyncpa [#allocation6], 0 }
   0x2   :  { %14 = vsyncpa [#allocation9], 0 }
   0x3   :  { %15 = vsyncpa [#allocation12], 0 }
   0x4   :  { %16 = vsyncpa [#allocation4], 0  ;;  %s1878_s24 = smov [#allocation5]  }
   0x5   :  { %s32_s25 = sshll.u32 %s1878_s24, 4  ;;  %s33_s25 = int_to_ptr.vmem [resolvable:$true] %s32_s25 }
   0x6   :  { %s1736_s26 = scalar_lea.vmem %s33_s25, 65536  ;;  %p1741_p1 = scmp.lt.s32.totalorder %s33_s25, %s33_s25 }
   0x7   :  { %p1737_p0 = scmp.ne.s32.totalorder %s33_s25, %s1736_s26  ;;  %p1742_p2 = scmp.lt.s32.totalorder %s1736_s26, %s1736_s26 }
   0x9   :  { %p1743_p3 = por %p1742_p2, %p1741_p1 }
   0xb   :  { %p1744_p4 = pnand %p1743_p3, %p1737_p0 }
   0xd   :  { %1747 = shalt.err (!%p1744_p4)
}
   0xe   :  { %s1879_s27 = smov 512   ;;  %s1880_s28 = smov 32  }
   0xf   :  { %38 = dma.hbm_to_vmem [thread:$0]  %s2115_s1, 65536, %s33_s25, [#allocation6], %s1879_s27, %s1879_s27, %s1880_s28  }
  0x10   :  { %s1881_s8 = smov [#allocation8]  }
  0x11   :  { %s54_s9 = sshll.u32 %s1881_s8, 4  ;;  %s55_s9 = int_to_ptr.vmem [resolvable:$true] %s54_s9 }
  0x12   :  { %s1756_s10 = scalar_lea.vmem %s55_s9, 16384  ;;  %p1761_p6 = scmp.lt.s32.totalorder %s55_s9, %s55_s9 }
  0x13   :  { %p1757_p5 = scmp.ne.s32.totalorder %s55_s9, %s1756_s10  ;;  %p1762_p7 = scmp.lt.s32.totalorder %s1756_s10, %s1756_s10 }
  0x15   :  { %p1763_p8 = por %p1762_p7, %p1761_p6 }
  0x17   :  { %p1764_p9 = pnand %p1763_p8, %p1757_p5 }
  0x19   :  { %1767 = shalt.err (!%p1764_p9)
}
  0x1a   :  { %s1882_s11 = smov 256   ;;  %s1883_s12 = smov 16  }
  0x1b   :  { %60 = dma.hbm_to_vmem [thread:$0]  %s2117_s3, 16384, %s55_s9, [#allocation9], %s1882_s11, %s1882_s11, %s1883_s12  }
  0x1c   :  { %s1884_s15 = smov [#allocation2]   ;;  %s1885_s17 = smov [#allocation7]  }
  0x1d   :  { %s23_s16 = sshll.u32 %s1884_s15, 4  ;;  %s45_s1 = sshll.u32 %s1885_s17, 4  ;;  %s24_s16 = int_to_ptr.vmem [resolvable:$true] %s23_s16  ;;  %s46_s1 = int_to_ptr.vmem [resolvable:$true] %s45_s1 }
  0x1e   :  { %s1776_s18 = scalar_lea.vmem %s24_s16, 256  ;;  %p1781_p11 = scmp.lt.s32.totalorder %s24_s16, %s24_s16 }
  0x1f   :  { %p1777_p10 = scmp.ne.s32.totalorder %s24_s16, %s1776_s18  ;;  %p1782_p12 = scmp.lt.s32.totalorder %s1776_s18, %s1776_s18 }
  0x21   :  { %p1783_p13 = por %p1782_p12, %p1781_p11 }
  0x23   :  { %p1784_p0 = pnand %p1783_p13, %p1777_p10 }
  0x25   :  { %1787 = shalt.err (!%p1784_p0)
}
  0x26   :  { %26 = dma.hbm_to_vmem [thread:$0]  %s2114_s0, 256, %s24_s16, [#allocation3]  }
  0x27   :  { %s1796_s21 = scalar_lea.vmem %s46_s1, 64  ;;  %p1801_p2 = scmp.lt.s32.totalorder %s46_s1, %s46_s1 }
  0x28   :  { %p1797_p1 = scmp.ne.s32.totalorder %s46_s1, %s1796_s21  ;;  %p1802_p3 = scmp.lt.s32.totalorder %s1796_s21, %s1796_s21 }
  0x2a   :  { %p1803_p4 = por %p1802_p3, %p1801_p2 }
  0x2c   :  { %p1804_p5 = pnand %p1803_p4, %p1797_p1 }
  0x2e   :  { %1807 = shalt.err (!%p1804_p5)
}
  0x2f   :  { %48 = dma.hbm_to_vmem [thread:$0]  %s2116_s2, 64, %s46_s1, [#allocation6]  }
  0x30   :  { %s1886_s23 = smov [#allocation10]   ;;  %s1887_s25 = smov [#allocation11]  }
  0x31   :  { %s67_s24 = sshll.u32 %s1886_s23, 4  ;;  %s79_s26 = sshll.u32 %s1887_s25, 4  ;;  %s68_s24 = int_to_ptr.vmem [resolvable:$true] %s67_s24  ;;  %s80_s26 = int_to_ptr.vmem [resolvable:$true] %s79_s26 }
  0x32   :  { %s1816_s27 = scalar_lea.vmem %s68_s24, 32  ;;  %p1821_p7 = scmp.lt.s32.totalorder %s68_s24, %s68_s24 }
  0x33   :  { %p1817_p6 = scmp.ne.s32.totalorder %s68_s24, %s1816_s27  ;;  %p1822_p8 = scmp.lt.s32.totalorder %s1816_s27, %s1816_s27 }
  0x35   :  { %p1823_p9 = por %p1822_p8, %p1821_p7 }
  0x37   :  { %p1824_p10 = pnand %p1823_p9, %p1817_p6 }
  0x39   :  { %1827 = shalt.err (!%p1824_p10)
}
  0x3a   :  { %70 = dma.hbm_to_vmem [thread:$0]  %s2118_s4, 32, %s68_s24, [#allocation9]  }
  0x3b   :  { %s1836_s29 = scalar_lea.vmem %s80_s26, 16  ;;  %s1840_s2 = scalar_lea.vmem %s80_s26, 32 }
  0x3c   :  { %p1837_p11 = scmp.ne.s32.totalorder %s80_s26, %s1836_s29  ;;  %p1841_p12 = scmp.lt.s32.totalorder %s80_s26, %s80_s26 }
  0x3d   :  { %p1842_p13 = scmp.lt.s32.totalorder %s1840_s2, %s1836_s29 }
  0x3f   :  { %p1843_p0 = por %p1842_p13, %p1841_p12 }
  0x41   :  { %p1844_p1 = pnand %p1843_p0, %p1837_p11 }
  0x43   :  { %1847 = shalt.err (!%p1844_p1)
}
  0x44   :  { %82 = dma.hbm_to_vmem [thread:$0]  %s2120_s6, 16, %s80_s26, [#allocation12]  }
  0x45   :  { %1868 = dma.done.wait [#allocation3], 256  }
  0x46   :  { %1869 = vsyncadd [#allocation3], 4294967040 }
  0x47   :  { %1870 = dma.done.wait [#allocation6], 65600  }
  0x48   :  { %1871 = vsyncadd [#allocation6], 4294901696 }
  0x49   :  { %1872 = dma.done.wait [#allocation9], 16416  }
  0x4a   :  { %1873 = vsyncadd [#allocation9], 4294950880 }
  0x4b   :  { %1874 = dma.done.wait [#allocation12], 16  }
  0x4c   :  { %1875 = vsyncadd [#allocation12], 4294967280  ;;  %v164_v0 = vld [vmem:[#allocation5 + $0x1e8] sm:$0xff]  ;;  %v163_v2 = vld [vmem:[#allocation5 + $0x1e0] sm:$0xff]  ;;  %vm1658_vm6 = vcmask 254976  }
  0x4d   :  { %v292_v1 = vld [vmem:[#allocation5 + $0x5e8] sm:$0xff]  ;;  %681 = vmatprep.subr.mxu0 %v164_v0  ;;  %v291_v3 = vld [vmem:[#allocation5 + $0x5e0] sm:$0xff] }
  0x4e   :  { %752 = vmatprep.subr.mxu1 %v292_v1  ;;  %v160_v4 = vld [vmem:[#allocation5 + $0x1c8] sm:$0xff]  ;;  %682 = vmatpush1.msra.mxu0 %v163_v2  ;;  %v159_v6 = vld [vmem:[#allocation5 + $0x1c0] sm:$0xff] }
  0x4f   :  { %v288_v5 = vld [vmem:[#allocation5 + $0x5c8] sm:$0xff]  ;;  %753 = vmatpush1.msra.mxu1 %v291_v3  ;;  %v287_v7 = vld [vmem:[#allocation5 + $0x5c0] sm:$0xff]  ;;  %683 = vmatprep.subr.mxu0 %v160_v4 }
  0x50   :  { %v156_v8 = vld [vmem:[#allocation5 + $0x1a8] sm:$0xff]  ;;  %754 = vmatprep.subr.mxu1 %v288_v5  ;;  %v155_v10 = vld [vmem:[#allocation5 + $0x1a0] sm:$0xff]  ;;  %684 = vmatpush1.msra.mxu0 %v159_v6 }
  0x51   :  { %v284_v9 = vld [vmem:[#allocation5 + $0x5a8] sm:$0xff]  ;;  %v283_v11 = vld [vmem:[#allocation5 + $0x5a0] sm:$0xff]  ;;  %755 = vmatpush1.msra.mxu1 %v287_v7  ;;  %685 = vmatprep.subr.mxu0 %v156_v8 }
  0x52   :  { %v152_v12 = vld [vmem:[#allocation5 + $0x188] sm:$0xff]  ;;  %756 = vmatprep.subr.mxu1 %v284_v9  ;;  %v151_v14 = vld [vmem:[#allocation5 + $0x180] sm:$0xff]  ;;  %686 = vmatpush1.msra.mxu0 %v155_v10 }
  0x53   :  { %v280_v13 = vld [vmem:[#allocation5 + $0x588] sm:$0xff]  ;;  %v279_v15 = vld [vmem:[#allocation5 + $0x580] sm:$0xff]  ;;  %757 = vmatpush1.msra.mxu1 %v283_v11  ;;  %687 = vmatprep.subr.mxu0 %v152_v12 }
  0x54   :  { %v148_v16 = vld [vmem:[#allocation5 + $0x168] sm:$0xff]  ;;  %758 = vmatprep.subr.mxu1 %v280_v13  ;;  %v147_v18 = vld [vmem:[#allocation5 + $0x160] sm:$0xff]  ;;  %688 = vmatpush1.msra.mxu0 %v151_v14 }
  0x55   :  { %v276_v17 = vld [vmem:[#allocation5 + $0x568] sm:$0xff]  ;;  %v275_v19 = vld [vmem:[#allocation5 + $0x560] sm:$0xff]  ;;  %759 = vmatpush1.msra.mxu1 %v279_v15  ;;  %689 = vmatprep.subr.mxu0 %v148_v16 }
  0x56   :  { %v144_v20 = vld [vmem:[#allocation5 + $0x148] sm:$0xff]  ;;  %760 = vmatprep.subr.mxu1 %v276_v17  ;;  %v143_v22 = vld [vmem:[#allocation5 + $0x140] sm:$0xff]  ;;  %690 = vmatpush1.msra.mxu0 %v147_v18 }
  0x57   :  { %v272_v21 = vld [vmem:[#allocation5 + $0x548] sm:$0xff]  ;;  %v271_v23 = vld [vmem:[#allocation5 + $0x540] sm:$0xff]  ;;  %761 = vmatpush1.msra.mxu1 %v275_v19  ;;  %691 = vmatprep.subr.mxu0 %v144_v20 }
  0x58   :  { %v140_v24 = vld [vmem:[#allocation5 + $0x128] sm:$0xff]  ;;  %762 = vmatprep.subr.mxu1 %v272_v21  ;;  %v139_v26 = vld [vmem:[#allocation5 + $0x120] sm:$0xff]  ;;  %692 = vmatpush1.msra.mxu0 %v143_v22 }
  0x59   :  { %v268_v25 = vld [vmem:[#allocation5 + $0x528] sm:$0xff]  ;;  %v267_v27 = vld [vmem:[#allocation5 + $0x520] sm:$0xff]  ;;  %763 = vmatpush1.msra.mxu1 %v271_v23  ;;  %693 = vmatprep.subr.mxu0 %v140_v24 }
  0x5a   :  { %v136_v28 = vld [vmem:[#allocation5 + $0x108] sm:$0xff]  ;;  %764 = vmatprep.subr.mxu1 %v268_v25  ;;  %v135_v30 = vld [vmem:[#allocation5 + $0x100] sm:$0xff]  ;;  %694 = vmatpush1.msra.mxu0 %v139_v26 }
  0x5b   :  { %v264_v29 = vld [vmem:[#allocation5 + $0x508] sm:$0xff]  ;;  %v263_v31 = vld [vmem:[#allocation5 + $0x500] sm:$0xff]  ;;  %765 = vmatpush1.msra.mxu1 %v267_v27  ;;  %695 = vmatprep.subr.mxu0 %v136_v28 }
  0x5c   :  { %v132_v32 = vld [vmem:[#allocation5 + $0xe8] sm:$0xff]  ;;  %766 = vmatprep.subr.mxu1 %v264_v29  ;;  %v131_v34 = vld [vmem:[#allocation5 + $0xe0] sm:$0xff]  ;;  %696 = vmatpush1.msra.mxu0 %v135_v30  ;;  %v617_v30 = vlaneseq }
  0x5d   :  { %v260_v33 = vld [vmem:[#allocation5 + $0x4e8] sm:$0xff]  ;;  %v259_v35 = vld [vmem:[#allocation5 + $0x4e0] sm:$0xff]  ;;  %767 = vmatpush1.msra.mxu1 %v263_v31  ;;  %697 = vmatprep.subr.mxu0 %v132_v32  ;;  %v1888_v31 = vmov 1983009808  }
  0x5e   :  { %v128_v36 = vld [vmem:[#allocation5 + $0xc8] sm:$0xff]  ;;  %768 = vmatprep.subr.mxu1 %v260_v33  ;;  %v127_v38 = vld [vmem:[#allocation5 + $0xc0] sm:$0xff]  ;;  %698 = vmatpush1.msra.mxu0 %v131_v34  ;;  %v641_v32 = vunpack.c.l.s4 %v1888_v31 }
  0x5f   :  { %v256_v37 = vld [vmem:[#allocation5 + $0x4c8] sm:$0xff]  ;;  %v255_v39 = vld [vmem:[#allocation5 + $0x4c0] sm:$0xff]  ;;  %769 = vmatpush1.msra.mxu1 %v259_v35  ;;  %699 = vmatprep.subr.mxu0 %v128_v36 }
  0x60   :  { %v124_v40 = vld [vmem:[#allocation5 + $0xa8] sm:$0xff]  ;;  %770 = vmatprep.subr.mxu1 %v256_v37  ;;  %v123_v42 = vld [vmem:[#allocation5 + $0xa0] sm:$0xff]  ;;  %700 = vmatpush1.msra.mxu0 %v127_v38 }
  0x61   :  { %v252_v41 = vld [vmem:[#allocation5 + $0x4a8] sm:$0xff]  ;;  %v251_v43 = vld [vmem:[#allocation5 + $0x4a0] sm:$0xff]  ;;  %771 = vmatpush1.msra.mxu1 %v255_v39  ;;  %701 = vmatprep.subr.mxu0 %v124_v40 }
  0x62   :  { %v120_v44 = vld [vmem:[#allocation5 + $0x88] sm:$0xff]  ;;  %772 = vmatprep.subr.mxu1 %v252_v41  ;;  %v119_v46 = vld [vmem:[#allocation5 + $0x80] sm:$0xff]  ;;  %702 = vmatpush1.msra.mxu0 %v123_v42  ;;  %v1948_v41 = vshrl.u32 %v617_v30, 7  ;;  %v642_v42 = vunpack.c.0.s8 %v641_v32 }
  0x63   :  { %v248_v45 = vld [vmem:[#allocation5 + $0x488] sm:$0xff]  ;;  %v247_v47 = vld [vmem:[#allocation5 + $0x480] sm:$0xff]  ;;  %773 = vmatpush1.msra.mxu1 %v251_v43  ;;  %703 = vmatprep.subr.mxu0 %v120_v44 }
  0x64   :  { %v116_v48 = vld [vmem:[#allocation5 + $0x68] sm:$0xff]  ;;  %774 = vmatprep.subr.mxu1 %v248_v45  ;;  %v115_v50 = vld [vmem:[#allocation5 + $0x60] sm:$0xff]  ;;  %704 = vmatpush1.msra.mxu0 %v119_v46 }
  0x65   :  { %v244_v49 = vld [vmem:[#allocation5 + $0x468] sm:$0xff]  ;;  %v243_v51 = vld [vmem:[#allocation5 + $0x460] sm:$0xff]  ;;  %775 = vmatpush1.msra.mxu1 %v247_v47  ;;  %705 = vmatprep.subr.mxu0 %v116_v48 }
  0x66   :  { %v112_v52 = vld [vmem:[#allocation5 + $0x48] sm:$0xff]  ;;  %776 = vmatprep.subr.mxu1 %v244_v49  ;;  %v111_v54 = vld [vmem:[#allocation5 + $0x40] sm:$0xff]  ;;  %706 = vmatpush1.msra.mxu0 %v115_v50  ;;  %v101_v49 = vld [vmem:[#allocation2] sm:$0xff] }
  0x67   :  { %v240_v53 = vld [vmem:[#allocation5 + $0x448] sm:$0xff]  ;;  %v239_v55 = vld [vmem:[#allocation5 + $0x440] sm:$0xff]  ;;  %777 = vmatpush1.msra.mxu1 %v243_v51  ;;  %707 = vmatprep.subr.mxu0 %v112_v52  ;;  %v1951_v52 = vsub.s32 %v642_v42, %v1948_v41 }
  0x68   :  { %v108_v56 = vld [vmem:[#allocation5 + $0x28] sm:$0xff]  ;;  %778 = vmatprep.subr.mxu1 %v240_v53  ;;  %v107_v58 = vld [vmem:[#allocation5 + $0x20] sm:$0xff]  ;;  %708 = vmatpush1.msra.mxu0 %v111_v54 }
  0x69   :  { %v236_v57 = vld [vmem:[#allocation5 + $0x428] sm:$0xff]  ;;  %v235_v59 = vld [vmem:[#allocation5 + $0x420] sm:$0xff]  ;;  %779 = vmatpush1.msra.mxu1 %v239_v55  ;;  %709 = vmatprep.subr.mxu0 %v108_v56 }
  0x6a   :  { %v104_v60 = vld [vmem:[#allocation5 + $0x8] sm:$0xff]  ;;  %780 = vmatprep.subr.mxu1 %v236_v57  ;;  %v103_v62 = vld [vmem:[#allocation5] sm:$0xff]  ;;  %710 = vmatpush1.msra.mxu0 %v107_v58  ;;  %v639_v57 = vcombine.high %v101_v49, %v101_v49 }
  0x6b   :  { %v232_v61 = vld [vmem:[#allocation5 + $0x408] sm:$0xff]  ;;  %v231_v63 = vld [vmem:[#allocation5 + $0x400] sm:$0xff]  ;;  %781 = vmatpush1.msra.mxu1 %v235_v59  ;;  %711 = vmatprep.subr.mxu0 %v104_v60 }
  0x6c   :  { %v228_v0 = vld [vmem:[#allocation5 + $0x3e8] sm:$0xff]  ;;  %782 = vmatprep.subr.mxu1 %v232_v61  ;;  %v227_v2 = vld [vmem:[#allocation5 + $0x3e0] sm:$0xff]  ;;  %712 = vmatpush1.msra.mxu0 %v103_v62  ;;  %v1954_v62 = vrot.slane %v101_v49, %v1951_v52 }
  0x6d   :  { %v356_v1 = vld [vmem:[#allocation5 + $0x7e8] sm:$0xff]  ;;  %v355_v3 = vld [vmem:[#allocation5 + $0x7e0] sm:$0xff]  ;;  %783 = vmatpush1.msra.mxu1 %v231_v63  ;;  %713 = vmatprep.subr.mxu0 %v228_v0 }
  0x6e   :  { %v224_v4 = vld [vmem:[#allocation5 + $0x3c8] sm:$0xff]  ;;  %784 = vmatprep.subr.mxu1 %v356_v1  ;;  %v223_v6 = vld [vmem:[#allocation5 + $0x3c0] sm:$0xff]  ;;  %714 = vmatpush2.msra.mxu0 %v227_v2 }
  0x6f   :  { %v352_v5 = vld [vmem:[#allocation5 + $0x7c8] sm:$0xff]  ;;  %v351_v7 = vld [vmem:[#allocation5 + $0x7c0] sm:$0xff]  ;;  %785 = vmatpush2.msra.mxu1 %v355_v3  ;;  %715 = vmatprep.subr.mxu0 %v224_v4  ;;  %v1957_v3 = vrot.slane %v639_v57, %v1951_v52 }
  0x70   :  { %v220_v8 = vld [vmem:[#allocation5 + $0x3a8] sm:$0xff]  ;;  %786 = vmatprep.subr.mxu1 %v352_v5  ;;  %v219_v10 = vld [vmem:[#allocation5 + $0x3a0] sm:$0xff]  ;;  %716 = vmatpush2.msra.mxu0 %v223_v6 }
  0x71   :  { %v348_v9 = vld [vmem:[#allocation5 + $0x7a8] sm:$0xff]  ;;  %v347_v11 = vld [vmem:[#allocation5 + $0x7a0] sm:$0xff]  ;;  %787 = vmatpush2.msra.mxu1 %v351_v7  ;;  %717 = vmatprep.subr.mxu0 %v220_v8  ;;  %v1961_v8 = vcombine.high %v1954_v62, %v1954_v62 }
  0x72   :  { %v216_v12 = vld [vmem:[#allocation5 + $0x388] sm:$0xff]  ;;  %788 = vmatprep.subr.mxu1 %v348_v9  ;;  %v215_v14 = vld [vmem:[#allocation5 + $0x380] sm:$0xff]  ;;  %718 = vmatpush2.msra.mxu0 %v219_v10 }
  0x73   :  { %v344_v13 = vld [vmem:[#allocation5 + $0x788] sm:$0xff]  ;;  %v343_v15 = vld [vmem:[#allocation5 + $0x780] sm:$0xff]  ;;  %789 = vmatpush2.msra.mxu1 %v347_v11  ;;  %719 = vmatprep.subr.mxu0 %v216_v12  ;;  %v1965_v11 = vcombine.high %v1957_v3, %v1957_v3 }
  0x74   :  { %v212_v16 = vld [vmem:[#allocation5 + $0x368] sm:$0xff]  ;;  %790 = vmatprep.subr.mxu1 %v344_v13  ;;  %v211_v18 = vld [vmem:[#allocation5 + $0x360] sm:$0xff]  ;;  %720 = vmatpush2.msra.mxu0 %v215_v14 }
  0x75   :  { %v340_v17 = vld [vmem:[#allocation5 + $0x768] sm:$0xff]  ;;  %v339_v19 = vld [vmem:[#allocation5 + $0x760] sm:$0xff]  ;;  %791 = vmatpush2.msra.mxu1 %v343_v15  ;;  %721 = vmatprep.subr.mxu0 %v212_v16 }
  0x76   :  { %v208_v20 = vld [vmem:[#allocation5 + $0x348] sm:$0xff]  ;;  %792 = vmatprep.subr.mxu1 %v340_v17  ;;  %v207_v22 = vld [vmem:[#allocation5 + $0x340] sm:$0xff]  ;;  %722 = vmatpush2.msra.mxu0 %v211_v18 }
  0x77   :  { %v336_v21 = vld [vmem:[#allocation5 + $0x748] sm:$0xff]  ;;  %v335_v23 = vld [vmem:[#allocation5 + $0x740] sm:$0xff]  ;;  %793 = vmatpush2.msra.mxu1 %v339_v19  ;;  %723 = vmatprep.subr.mxu0 %v208_v20 }
  0x78   :  { %v204_v24 = vld [vmem:[#allocation5 + $0x328] sm:$0xff]  ;;  %794 = vmatprep.subr.mxu1 %v336_v21  ;;  %v203_v26 = vld [vmem:[#allocation5 + $0x320] sm:$0xff]  ;;  %724 = vmatpush2.msra.mxu0 %v207_v22 }
  0x79   :  { %v332_v25 = vld [vmem:[#allocation5 + $0x728] sm:$0xff]  ;;  %v331_v27 = vld [vmem:[#allocation5 + $0x720] sm:$0xff]  ;;  %795 = vmatpush2.msra.mxu1 %v335_v23  ;;  %725 = vmatprep.subr.mxu0 %v204_v24 }
  0x7a   :  { %v200_v28 = vld [vmem:[#allocation5 + $0x308] sm:$0xff]  ;;  %796 = vmatprep.subr.mxu1 %v332_v25  ;;  %v199_v33 = vld [vmem:[#allocation5 + $0x300] sm:$0xff]  ;;  %726 = vmatpush2.msra.mxu0 %v203_v26 }
  0x7b   :  { %v328_v29 = vld [vmem:[#allocation5 + $0x708] sm:$0xff]  ;;  %v327_v34 = vld [vmem:[#allocation5 + $0x700] sm:$0xff]  ;;  %797 = vmatpush2.msra.mxu1 %v331_v27  ;;  %727 = vmatprep.subr.mxu0 %v200_v28 }
  0x7c   :  { %v196_v35 = vld [vmem:[#allocation5 + $0x2e8] sm:$0xff]  ;;  %798 = vmatprep.subr.mxu1 %v328_v29  ;;  %v195_v37 = vld [vmem:[#allocation5 + $0x2e0] sm:$0xff]  ;;  %728 = vmatpush2.msra.mxu0 %v199_v33 }
  0x7d   :  { %v324_v36 = vld [vmem:[#allocation5 + $0x6e8] sm:$0xff]  ;;  %v323_v38 = vld [vmem:[#allocation5 + $0x6e0] sm:$0xff]  ;;  %799 = vmatpush2.msra.mxu1 %v327_v34  ;;  %729 = vmatprep.subr.mxu0 %v196_v35 }
  0x7e   :  { %v192_v39 = vld [vmem:[#allocation5 + $0x2c8] sm:$0xff]  ;;  %800 = vmatprep.subr.mxu1 %v324_v36  ;;  %v191_v43 = vld [vmem:[#allocation5 + $0x2c0] sm:$0xff]  ;;  %730 = vmatpush2.msra.mxu0 %v195_v37 }
  0x7f   :  { %v320_v40 = vld [vmem:[#allocation5 + $0x6c8] sm:$0xff]  ;;  %v319_v44 = vld [vmem:[#allocation5 + $0x6c0] sm:$0xff]  ;;  %801 = vmatpush2.msra.mxu1 %v323_v38  ;;  %731 = vmatprep.subr.mxu0 %v192_v39 }
  0x80   :  { %v188_v45 = vld [vmem:[#allocation5 + $0x2a8] sm:$0xff]  ;;  %802 = vmatprep.subr.mxu1 %v320_v40  ;;  %v187_v47 = vld [vmem:[#allocation5 + $0x2a0] sm:$0xff]  ;;  %732 = vmatpush2.msra.mxu0 %v191_v43 }
  0x81   :  { %v316_v46 = vld [vmem:[#allocation5 + $0x6a8] sm:$0xff]  ;;  %v315_v48 = vld [vmem:[#allocation5 + $0x6a0] sm:$0xff]  ;;  %803 = vmatpush2.msra.mxu1 %v319_v44  ;;  %733 = vmatprep.subr.mxu0 %v188_v45 }
  0x82   :  { %v184_v50 = vld [vmem:[#allocation5 + $0x288] sm:$0xff]  ;;  %804 = vmatprep.subr.mxu1 %v316_v46  ;;  %v183_v53 = vld [vmem:[#allocation5 + $0x280] sm:$0xff]  ;;  %734 = vmatpush2.msra.mxu0 %v187_v47 }
  0x83   :  { %v312_v51 = vld [vmem:[#allocation5 + $0x688] sm:$0xff]  ;;  %v311_v54 = vld [vmem:[#allocation5 + $0x680] sm:$0xff]  ;;  %805 = vmatpush2.msra.mxu1 %v315_v48  ;;  %735 = vmatprep.subr.mxu0 %v184_v50 }
  0x84   :  { %v180_v55 = vld [vmem:[#allocation5 + $0x268] sm:$0xff]  ;;  %806 = vmatprep.subr.mxu1 %v312_v51  ;;  %v179_v58 = vld [vmem:[#allocation5 + $0x260] sm:$0xff]  ;;  %736 = vmatpush2.msra.mxu0 %v183_v53 }
  0x85   :  { %v308_v56 = vld [vmem:[#allocation5 + $0x668] sm:$0xff]  ;;  %v307_v59 = vld [vmem:[#allocation5 + $0x660] sm:$0xff]  ;;  %807 = vmatpush2.msra.mxu1 %v311_v54  ;;  %737 = vmatprep.subr.mxu0 %v180_v55 }
  0x86   :  { %v176_v60 = vld [vmem:[#allocation5 + $0x248] sm:$0xff]  ;;  %808 = vmatprep.subr.mxu1 %v308_v56  ;;  %v175_v63 = vld [vmem:[#allocation5 + $0x240] sm:$0xff]  ;;  %738 = vmatpush2.msra.mxu0 %v179_v58 }
  0x87   :  { %v304_v61 = vld [vmem:[#allocation5 + $0x648] sm:$0xff]  ;;  %v303_v0 = vld [vmem:[#allocation5 + $0x640] sm:$0xff]  ;;  %809 = vmatpush2.msra.mxu1 %v307_v59  ;;  %739 = vmatprep.subr.mxu0 %v176_v60 }
  0x88   :  { %v172_v1 = vld [vmem:[#allocation5 + $0x228] sm:$0xff]  ;;  %810 = vmatprep.subr.mxu1 %v304_v61  ;;  %v171_v4 = vld [vmem:[#allocation5 + $0x220] sm:$0xff]  ;;  %740 = vmatpush2.msra.mxu0 %v175_v63 }
  0x89   :  { %v300_v2 = vld [vmem:[#allocation5 + $0x628] sm:$0xff]  ;;  %v299_v5 = vld [vmem:[#allocation5 + $0x620] sm:$0xff]  ;;  %811 = vmatpush2.msra.mxu1 %v303_v0  ;;  %741 = vmatprep.subr.mxu0 %v172_v1 }
  0x8a   :  { %v168_v6 = vld [vmem:[#allocation5 + $0x208] sm:$0xff]  ;;  %812 = vmatprep.subr.mxu1 %v300_v2  ;;  %v167_v9 = vld [vmem:[#allocation5 + $0x200] sm:$0xff]  ;;  %742 = vmatpush2.msra.mxu0 %v171_v4 }
  0x8b   :  { %v296_v7 = vld [vmem:[#allocation5 + $0x608] sm:$0xff]  ;;  %813 = vmatpush2.msra.mxu1 %v299_v5  ;;  %v295_v10 = vld [vmem:[#allocation5 + $0x600] sm:$0xff]  ;;  %743 = vmatprep.subr.mxu0 %v168_v6 }
  0x8c   :  { %814 = vmatprep.subr.mxu1 %v296_v7  ;;  %v420_v12 = vld [vmem:[#allocation5 + $0x9e8] sm:$0xff]  ;;  %744 = vmatpush2.msra.mxu0 %v167_v9  ;;  %v419_v14 = vld [vmem:[#allocation5 + $0x9e0] sm:$0xff] }
  0x8d   :  { %745 = vmatprep.mubr.f32.mxu0 %v1961_v8  ;;  %v548_v13 = vld [vmem:[#allocation5 + $0xde8] sm:$0xff]  ;;  %815 = vmatpush2.msra.mxu1 %v295_v10  ;;  %v547_v15 = vld [vmem:[#allocation5 + $0xde0] sm:$0xff] }
  0x8e   :  { %746 = vmatmul.mubr.f32.vlgmr.msra.gmra.mxu0 %v1954_v62  ;;  %816 = vmatprep.mubr.f32.mxu1 %v1965_v11  ;;  %v416_v16 = vld [vmem:[#allocation5 + $0x9c8] sm:$0xff]  ;;  %v415_v18 = vld [vmem:[#allocation5 + $0x9c0] sm:$0xff] }
  0x8f   :  { %823 = vmatprep.subr.mxu0 %v420_v12  ;;  %v544_v17 = vld [vmem:[#allocation5 + $0xdc8] sm:$0xff]  ;;  %894 = vmatprep.subr.mxu1 %v548_v13  ;;  %v543_v19 = vld [vmem:[#allocation5 + $0xdc0] sm:$0xff] }
  0x90   :  { %817 = vmatmul.mubr.f32.vlgmr.msra.gmra.mxu1 %v1957_v3  ;;  %824 = vmatpush1.msra.mxu0 %v419_v14  ;;  %v412_v20 = vld [vmem:[#allocation5 + $0x9a8] sm:$0xff]  ;;  %v411_v22 = vld [vmem:[#allocation5 + $0x9a0] sm:$0xff] }
  0x91   :  { %895 = vmatpush1.msra.mxu1 %v547_v15  ;;  %v540_v21 = vld [vmem:[#allocation5 + $0xda8] sm:$0xff]  ;;  %825 = vmatprep.subr.mxu0 %v416_v16  ;;  %v539_v23 = vld [vmem:[#allocation5 + $0xda0] sm:$0xff] }
  0x92   :  { %896 = vmatprep.subr.mxu1 %v544_v17  ;;  %826 = vmatpush1.msra.mxu0 %v415_v18  ;;  %v408_v24 = vld [vmem:[#allocation5 + $0x988] sm:$0xff]  ;;  %v407_v26 = vld [vmem:[#allocation5 + $0x980] sm:$0xff] }
  0x93   :  { %897 = vmatpush1.msra.mxu1 %v543_v19  ;;  %v536_v25 = vld [vmem:[#allocation5 + $0xd88] sm:$0xff]  ;;  %827 = vmatprep.subr.mxu0 %v412_v20  ;;  %v535_v27 = vld [vmem:[#allocation5 + $0xd80] sm:$0xff] }
  0x94   :  { %898 = vmatprep.subr.mxu1 %v540_v21  ;;  %828 = vmatpush1.msra.mxu0 %v411_v22  ;;  %v404_v28 = vld [vmem:[#allocation5 + $0x968] sm:$0xff]  ;;  %v403_v30 = vld [vmem:[#allocation5 + $0x960] sm:$0xff] }
  0x95   :  { %899 = vmatpush1.msra.mxu1 %v539_v23  ;;  %v532_v29 = vld [vmem:[#allocation5 + $0xd68] sm:$0xff]  ;;  %829 = vmatprep.subr.mxu0 %v408_v24  ;;  %v531_v31 = vld [vmem:[#allocation5 + $0xd60] sm:$0xff] }
  0x96   :  { %900 = vmatprep.subr.mxu1 %v536_v25  ;;  %830 = vmatpush1.msra.mxu0 %v407_v26  ;;  %v400_v32 = vld [vmem:[#allocation5 + $0x948] sm:$0xff]  ;;  %v399_v34 = vld [vmem:[#allocation5 + $0x940] sm:$0xff] }
  0x97   :  { %901 = vmatpush1.msra.mxu1 %v535_v27  ;;  %v528_v33 = vld [vmem:[#allocation5 + $0xd48] sm:$0xff]  ;;  %831 = vmatprep.subr.mxu0 %v404_v28  ;;  %v527_v35 = vld [vmem:[#allocation5 + $0xd40] sm:$0xff] }
  0x98   :  { %902 = vmatprep.subr.mxu1 %v532_v29  ;;  %832 = vmatpush1.msra.mxu0 %v403_v30  ;;  %v396_v36 = vld [vmem:[#allocation5 + $0x928] sm:$0xff]  ;;  %v395_v38 = vld [vmem:[#allocation5 + $0x920] sm:$0xff] }
  0x99   :  { %903 = vmatpush1.msra.mxu1 %v531_v31  ;;  %v524_v37 = vld [vmem:[#allocation5 + $0xd28] sm:$0xff]  ;;  %833 = vmatprep.subr.mxu0 %v400_v32  ;;  %v523_v39 = vld [vmem:[#allocation5 + $0xd20] sm:$0xff] }
  0x9a   :  { %904 = vmatprep.subr.mxu1 %v528_v33  ;;  %834 = vmatpush1.msra.mxu0 %v399_v34  ;;  %v392_v40 = vld [vmem:[#allocation5 + $0x908] sm:$0xff]  ;;  %v391_v43 = vld [vmem:[#allocation5 + $0x900] sm:$0xff] }
  0x9b   :  { %905 = vmatpush1.msra.mxu1 %v527_v35  ;;  %v520_v42 = vld [vmem:[#allocation5 + $0xd08] sm:$0xff]  ;;  %835 = vmatprep.subr.mxu0 %v396_v36  ;;  %v519_v44 = vld [vmem:[#allocation5 + $0xd00] sm:$0xff] }
  0x9c   :  { %906 = vmatprep.subr.mxu1 %v524_v37  ;;  %836 = vmatpush1.msra.mxu0 %v395_v38  ;;  %v388_v45 = vld [vmem:[#allocation5 + $0x8e8] sm:$0xff]  ;;  %v387_v47 = vld [vmem:[#allocation5 + $0x8e0] sm:$0xff] }
  0x9d   :  { %907 = vmatpush1.msra.mxu1 %v523_v39  ;;  %v516_v46 = vld [vmem:[#allocation5 + $0xce8] sm:$0xff]  ;;  %837 = vmatprep.subr.mxu0 %v392_v40  ;;  %v515_v48 = vld [vmem:[#allocation5 + $0xce0] sm:$0xff] }
  0x9e   :  { %908 = vmatprep.subr.mxu1 %v520_v42  ;;  %838 = vmatpush1.msra.mxu0 %v391_v43  ;;  %v384_v49 = vld [vmem:[#allocation5 + $0x8c8] sm:$0xff]  ;;  %v383_v51 = vld [vmem:[#allocation5 + $0x8c0] sm:$0xff] }
  0x9f   :  { %909 = vmatpush1.msra.mxu1 %v519_v44  ;;  %v512_v50 = vld [vmem:[#allocation5 + $0xcc8] sm:$0xff]  ;;  %839 = vmatprep.subr.mxu0 %v388_v45  ;;  %v511_v53 = vld [vmem:[#allocation5 + $0xcc0] sm:$0xff] }
  0xa0   :  { %910 = vmatprep.subr.mxu1 %v516_v46  ;;  %840 = vmatpush1.msra.mxu0 %v387_v47  ;;  %v380_v54 = vld [vmem:[#allocation5 + $0x8a8] sm:$0xff]  ;;  %v379_v56 = vld [vmem:[#allocation5 + $0x8a0] sm:$0xff] }
  0xa1   :  { %911 = vmatpush1.msra.mxu1 %v515_v48  ;;  %v508_v55 = vld [vmem:[#allocation5 + $0xca8] sm:$0xff]  ;;  %841 = vmatprep.subr.mxu0 %v384_v49  ;;  %v507_v57 = vld [vmem:[#allocation5 + $0xca0] sm:$0xff] }
  0xa2   :  { %912 = vmatprep.subr.mxu1 %v512_v50  ;;  %842 = vmatpush1.msra.mxu0 %v383_v51  ;;  %v376_v58 = vld [vmem:[#allocation5 + $0x888] sm:$0xff]  ;;  %v375_v60 = vld [vmem:[#allocation5 + $0x880] sm:$0xff] }
  0xa3   :  { %913 = vmatpush1.msra.mxu1 %v511_v53  ;;  %v504_v59 = vld [vmem:[#allocation5 + $0xc88] sm:$0xff]  ;;  %843 = vmatprep.subr.mxu0 %v380_v54  ;;  %v503_v61 = vld [vmem:[#allocation5 + $0xc80] sm:$0xff] }
  0xa4   :  { %914 = vmatprep.subr.mxu1 %v508_v55  ;;  %844 = vmatpush1.msra.mxu0 %v379_v56  ;;  %v372_v63 = vld [vmem:[#allocation5 + $0x868] sm:$0xff]  ;;  %v371_v1 = vld [vmem:[#allocation5 + $0x860] sm:$0xff] }
  0xa5   :  { %915 = vmatpush1.msra.mxu1 %v507_v57  ;;  %v500_v0 = vld [vmem:[#allocation5 + $0xc68] sm:$0xff]  ;;  %845 = vmatprep.subr.mxu0 %v376_v58  ;;  %v499_v2 = vld [vmem:[#allocation5 + $0xc60] sm:$0xff] }
  0xa6   :  { %916 = vmatprep.subr.mxu1 %v504_v59  ;;  %846 = vmatpush1.msra.mxu0 %v375_v60  ;;  %v368_v4 = vld [vmem:[#allocation5 + $0x848] sm:$0xff]  ;;  %v367_v6 = vld [vmem:[#allocation5 + $0x840] sm:$0xff] }
  0xa7   :  { %917 = vmatpush1.msra.mxu1 %v503_v61  ;;  %v496_v5 = vld [vmem:[#allocation5 + $0xc48] sm:$0xff]  ;;  %847 = vmatprep.subr.mxu0 %v372_v63  ;;  %v495_v7 = vld [vmem:[#allocation5 + $0xc40] sm:$0xff] }
  0xa8   :  { %918 = vmatprep.subr.mxu1 %v500_v0  ;;  %848 = vmatpush1.msra.mxu0 %v371_v1  ;;  %v364_v9 = vld [vmem:[#allocation5 + $0x828] sm:$0xff]  ;;  %v363_v12 = vld [vmem:[#allocation5 + $0x820] sm:$0xff]  ;;  %v102_v1 = vld [vmem:[#allocation2 + $0x8] sm:$0xff] }
  0xa9   :  { %919 = vmatpush1.msra.mxu1 %v499_v2  ;;  %v492_v10 = vld [vmem:[#allocation5 + $0xc28] sm:$0xff]  ;;  %849 = vmatprep.subr.mxu0 %v368_v4  ;;  %v491_v13 = vld [vmem:[#allocation5 + $0xc20] sm:$0xff] }
  0xaa   :  { %920 = vmatprep.subr.mxu1 %v496_v5  ;;  %850 = vmatpush1.msra.mxu0 %v367_v6  ;;  %v360_v14 = vld [vmem:[#allocation5 + $0x808] sm:$0xff]  ;;  %v359_v16 = vld [vmem:[#allocation5 + $0x800] sm:$0xff] }
  0xab   :  { %921 = vmatpush1.msra.mxu1 %v495_v7  ;;  %v488_v15 = vld [vmem:[#allocation5 + $0xc08] sm:$0xff]  ;;  %851 = vmatprep.subr.mxu0 %v364_v9  ;;  %v487_v17 = vld [vmem:[#allocation5 + $0xc00] sm:$0xff] }
  0xac   :  { %922 = vmatprep.subr.mxu1 %v492_v10  ;;  %852 = vmatpush1.msra.mxu0 %v363_v12  ;;  %v484_v18 = vld [vmem:[#allocation5 + $0xbe8] sm:$0xff]  ;;  %v483_v20 = vld [vmem:[#allocation5 + $0xbe0] sm:$0xff]  ;;  %v656_v10 = vcombine.high %v102_v1, %v102_v1 }
  0xad   :  { %923 = vmatpush1.msra.mxu1 %v491_v13  ;;  %v612_v19 = vld [vmem:[#allocation5 + $0xfe8] sm:$0xff]  ;;  %853 = vmatprep.subr.mxu0 %v360_v14  ;;  %v611_v21 = vld [vmem:[#allocation5 + $0xfe0] sm:$0xff] }
  0xae   :  { %924 = vmatprep.subr.mxu1 %v488_v15  ;;  %854 = vmatpush1.msra.mxu0 %v359_v16  ;;  %v480_v22 = vld [vmem:[#allocation5 + $0xbc8] sm:$0xff]  ;;  %v479_v24 = vld [vmem:[#allocation5 + $0xbc0] sm:$0xff]  ;;  %v1972_v16 = vrot.slane %v102_v1, %v1951_v52  ;;  %v262_v1 = vld [vmem:[#allocation5 + $0x4f8] sm:$0xff] }
  0xaf   :  { %925 = vmatpush1.msra.mxu1 %v487_v17  ;;  %v608_v23 = vld [vmem:[#allocation5 + $0xfc8] sm:$0xff]  ;;  %855 = vmatprep.subr.mxu0 %v484_v18  ;;  %v607_v25 = vld [vmem:[#allocation5 + $0xfc0] sm:$0xff] }
  0xb0   :  { %926 = vmatprep.subr.mxu1 %v612_v19  ;;  %856 = vmatpush2.msra.mxu0 %v483_v20  ;;  %v476_v26 = vld [vmem:[#allocation5 + $0xba8] sm:$0xff]  ;;  %v475_v28 = vld [vmem:[#allocation5 + $0xba0] sm:$0xff] }
  0xb1   :  { %927 = vmatpush2.msra.mxu1 %v611_v21  ;;  %v604_v27 = vld [vmem:[#allocation5 + $0xfa8] sm:$0xff]  ;;  %857 = vmatprep.subr.mxu0 %v480_v22  ;;  %v603_v29 = vld [vmem:[#allocation5 + $0xfa0] sm:$0xff]  ;;  %v1975_v21 = vrot.slane %v656_v10, %v1951_v52  ;;  %v126_v10 = vld [vmem:[#allocation5 + $0xb8] sm:$0xff] }
  0xb2   :  { %928 = vmatprep.subr.mxu1 %v608_v23  ;;  %858 = vmatpush2.msra.mxu0 %v479_v24  ;;  %v472_v30 = vld [vmem:[#allocation5 + $0xb88] sm:$0xff]  ;;  %v471_v32 = vld [vmem:[#allocation5 + $0xb80] sm:$0xff] }
  0xb3   :  { %929 = vmatpush2.msra.mxu1 %v607_v25  ;;  %v600_v31 = vld [vmem:[#allocation5 + $0xf88] sm:$0xff]  ;;  %859 = vmatprep.subr.mxu0 %v476_v26  ;;  %v599_v33 = vld [vmem:[#allocation5 + $0xf80] sm:$0xff]  ;;  %v1979_v26 = vcombine.high %v1972_v16, %v1972_v16  ;;  %v1983_v52 = vcombine.high %v1975_v21, %v1975_v21 }
  0xb4   :  { %930 = vmatprep.subr.mxu1 %v604_v27  ;;  %860 = vmatpush2.msra.mxu0 %v475_v28  ;;  %v468_v34 = vld [vmem:[#allocation5 + $0xb68] sm:$0xff]  ;;  %v467_v36 = vld [vmem:[#allocation5 + $0xb60] sm:$0xff] }
  0xb5   :  { %931 = vmatpush2.msra.mxu1 %v603_v29  ;;  %v596_v35 = vld [vmem:[#allocation5 + $0xf68] sm:$0xff]  ;;  %861 = vmatprep.subr.mxu0 %v472_v30  ;;  %v595_v37 = vld [vmem:[#allocation5 + $0xf60] sm:$0xff]  ;;  %v166_v29 = vld [vmem:[#allocation5 + $0x1f8] sm:$0xff] }
  0xb6   :  { %932 = vmatprep.subr.mxu1 %v600_v31  ;;  %862 = vmatpush2.msra.mxu0 %v471_v32  ;;  %v464_v38 = vld [vmem:[#allocation5 + $0xb48] sm:$0xff]  ;;  %v463_v40 = vld [vmem:[#allocation5 + $0xb40] sm:$0xff]  ;;  %v294_v30 = vld [vmem:[#allocation5 + $0x5f8] sm:$0xff] }
  0xb7   :  { %933 = vmatpush2.msra.mxu1 %v599_v33  ;;  %v592_v39 = vld [vmem:[#allocation5 + $0xf48] sm:$0xff]  ;;  %863 = vmatprep.subr.mxu0 %v468_v34  ;;  %v591_v42 = vld [vmem:[#allocation5 + $0xf40] sm:$0xff]  ;;  %v165_v31 = vld [vmem:[#allocation5 + $0x1f0] sm:$0xff] }
  0xb8   :  { %934 = vmatprep.subr.mxu1 %v596_v35  ;;  %864 = vmatpush2.msra.mxu0 %v467_v36  ;;  %v460_v43 = vld [vmem:[#allocation5 + $0xb28] sm:$0xff]  ;;  %v459_v45 = vld [vmem:[#allocation5 + $0xb20] sm:$0xff]  ;;  %v293_v32 = vld [vmem:[#allocation5 + $0x5f0] sm:$0xff] }
  0xb9   :  { %935 = vmatpush2.msra.mxu1 %v595_v37  ;;  %v588_v44 = vld [vmem:[#allocation5 + $0xf28] sm:$0xff]  ;;  %865 = vmatprep.subr.mxu0 %v464_v38  ;;  %v587_v46 = vld [vmem:[#allocation5 + $0xf20] sm:$0xff]  ;;  %v162_v33 = vld [vmem:[#allocation5 + $0x1d8] sm:$0xff] }
  0xba   :  { %936 = vmatprep.subr.mxu1 %v592_v39  ;;  %866 = vmatpush2.msra.mxu0 %v463_v40  ;;  %v456_v47 = vld [vmem:[#allocation5 + $0xb08] sm:$0xff]  ;;  %v455_v49 = vld [vmem:[#allocation5 + $0xb00] sm:$0xff]  ;;  %v290_v34 = vld [vmem:[#allocation5 + $0x5d8] sm:$0xff] }
  0xbb   :  { %937 = vmatpush2.msra.mxu1 %v591_v42  ;;  %v584_v48 = vld [vmem:[#allocation5 + $0xf08] sm:$0xff]  ;;  %867 = vmatprep.subr.mxu0 %v460_v43  ;;  %v583_v50 = vld [vmem:[#allocation5 + $0xf00] sm:$0xff]  ;;  %v161_v35 = vld [vmem:[#allocation5 + $0x1d0] sm:$0xff] }
  0xbc   :  { %938 = vmatprep.subr.mxu1 %v588_v44  ;;  %868 = vmatpush2.msra.mxu0 %v459_v45  ;;  %v452_v51 = vld [vmem:[#allocation5 + $0xae8] sm:$0xff]  ;;  %v451_v54 = vld [vmem:[#allocation5 + $0xae0] sm:$0xff]  ;;  %v289_v36 = vld [vmem:[#allocation5 + $0x5d0] sm:$0xff] }
  0xbd   :  { %939 = vmatpush2.msra.mxu1 %v587_v46  ;;  %v580_v53 = vld [vmem:[#allocation5 + $0xee8] sm:$0xff]  ;;  %869 = vmatprep.subr.mxu0 %v456_v47  ;;  %v579_v55 = vld [vmem:[#allocation5 + $0xee0] sm:$0xff]  ;;  %v158_v37 = vld [vmem:[#allocation5 + $0x1b8] sm:$0xff] }
  0xbe   :  { %940 = vmatprep.subr.mxu1 %v584_v48  ;;  %870 = vmatpush2.msra.mxu0 %v455_v49  ;;  %v448_v56 = vld [vmem:[#allocation5 + $0xac8] sm:$0xff]  ;;  %v447_v58 = vld [vmem:[#allocation5 + $0xac0] sm:$0xff]  ;;  %v286_v38 = vld [vmem:[#allocation5 + $0x5b8] sm:$0xff] }
  0xbf   :  { %941 = vmatpush2.msra.mxu1 %v583_v50  ;;  %v576_v57 = vld [vmem:[#allocation5 + $0xec8] sm:$0xff]  ;;  %871 = vmatprep.subr.mxu0 %v452_v51  ;;  %v575_v59 = vld [vmem:[#allocation5 + $0xec0] sm:$0xff]  ;;  %v157_v39 = vld [vmem:[#allocation5 + $0x1b0] sm:$0xff] }
  0xc0   :  { %942 = vmatprep.subr.mxu1 %v580_v53  ;;  %872 = vmatpush2.msra.mxu0 %v451_v54  ;;  %v444_v60 = vld [vmem:[#allocation5 + $0xaa8] sm:$0xff]  ;;  %v443_v63 = vld [vmem:[#allocation5 + $0xaa0] sm:$0xff]  ;;  %v285_v40 = vld [vmem:[#allocation5 + $0x5b0] sm:$0xff] }
  0xc1   :  { %943 = vmatpush2.msra.mxu1 %v579_v55  ;;  %v572_v61 = vld [vmem:[#allocation5 + $0xea8] sm:$0xff]  ;;  %873 = vmatprep.subr.mxu0 %v448_v56  ;;  %v571_v0 = vld [vmem:[#allocation5 + $0xea0] sm:$0xff]  ;;  %v154_v42 = vld [vmem:[#allocation5 + $0x198] sm:$0xff] }
  0xc2   :  { %944 = vmatprep.subr.mxu1 %v576_v57  ;;  %874 = vmatpush2.msra.mxu0 %v447_v58  ;;  %v440_v2 = vld [vmem:[#allocation5 + $0xa88] sm:$0xff]  ;;  %v439_v5 = vld [vmem:[#allocation5 + $0xa80] sm:$0xff]  ;;  %v282_v43 = vld [vmem:[#allocation5 + $0x598] sm:$0xff] }
  0xc3   :  { %945 = vmatpush2.msra.mxu1 %v575_v59  ;;  %v568_v4 = vld [vmem:[#allocation5 + $0xe88] sm:$0xff]  ;;  %875 = vmatprep.subr.mxu0 %v444_v60  ;;  %v567_v6 = vld [vmem:[#allocation5 + $0xe80] sm:$0xff]  ;;  %v153_v44 = vld [vmem:[#allocation5 + $0x190] sm:$0xff] }
  0xc4   :  { %946 = vmatprep.subr.mxu1 %v572_v61  ;;  %876 = vmatpush2.msra.mxu0 %v443_v63  ;;  %v436_v7 = vld [vmem:[#allocation5 + $0xa68] sm:$0xff]  ;;  %v435_v12 = vld [vmem:[#allocation5 + $0xa60] sm:$0xff]  ;;  %v281_v45 = vld [vmem:[#allocation5 + $0x590] sm:$0xff] }
  0xc5   :  { %947 = vmatpush2.msra.mxu1 %v571_v0  ;;  %v564_v9 = vld [vmem:[#allocation5 + $0xe68] sm:$0xff]  ;;  %877 = vmatprep.subr.mxu0 %v440_v2  ;;  %v563_v13 = vld [vmem:[#allocation5 + $0xe60] sm:$0xff]  ;;  %v150_v46 = vld [vmem:[#allocation5 + $0x178] sm:$0xff] }
  0xc6   :  { %948 = vmatprep.subr.mxu1 %v568_v4  ;;  %878 = vmatpush2.msra.mxu0 %v439_v5  ;;  %v432_v14 = vld [vmem:[#allocation5 + $0xa48] sm:$0xff]  ;;  %v431_v17 = vld [vmem:[#allocation5 + $0xa40] sm:$0xff]  ;;  %v278_v47 = vld [vmem:[#allocation5 + $0x578] sm:$0xff] }
  0xc7   :  { %949 = vmatpush2.msra.mxu1 %v567_v6  ;;  %v560_v15 = vld [vmem:[#allocation5 + $0xe48] sm:$0xff]  ;;  %879 = vmatprep.subr.mxu0 %v436_v7  ;;  %v559_v18 = vld [vmem:[#allocation5 + $0xe40] sm:$0xff]  ;;  %v149_v48 = vld [vmem:[#allocation5 + $0x170] sm:$0xff] }
  0xc8   :  { %950 = vmatprep.subr.mxu1 %v564_v9  ;;  %880 = vmatpush2.msra.mxu0 %v435_v12  ;;  %v428_v19 = vld [vmem:[#allocation5 + $0xa28] sm:$0xff]  ;;  %v427_v22 = vld [vmem:[#allocation5 + $0xa20] sm:$0xff]  ;;  %v277_v49 = vld [vmem:[#allocation5 + $0x570] sm:$0xff] }
  0xc9   :  { %951 = vmatpush2.msra.mxu1 %v563_v13  ;;  %v556_v20 = vld [vmem:[#allocation5 + $0xe28] sm:$0xff]  ;;  %881 = vmatprep.subr.mxu0 %v432_v14  ;;  %v555_v23 = vld [vmem:[#allocation5 + $0xe20] sm:$0xff]  ;;  %v146_v50 = vld [vmem:[#allocation5 + $0x158] sm:$0xff] }
  0xca   :  { %952 = vmatprep.subr.mxu1 %v560_v15  ;;  %882 = vmatpush2.msra.mxu0 %v431_v17  ;;  %v424_v24 = vld [vmem:[#allocation5 + $0xa08] sm:$0xff]  ;;  %v423_v27 = vld [vmem:[#allocation5 + $0xa00] sm:$0xff]  ;;  %v274_v51 = vld [vmem:[#allocation5 + $0x558] sm:$0xff] }
  0xcb   :  { %953 = vmatpush2.msra.mxu1 %v559_v18  ;;  %v552_v25 = vld [vmem:[#allocation5 + $0xe08] sm:$0xff]  ;;  %883 = vmatprep.subr.mxu0 %v428_v19  ;;  %v551_v28 = vld [vmem:[#allocation5 + $0xe00] sm:$0xff]  ;;  %v145_v53 = vld [vmem:[#allocation5 + $0x150] sm:$0xff] }
  0xcc   :  { %954 = vmatprep.subr.mxu1 %v556_v20  ;;  %884 = vmatpush2.msra.mxu0 %v427_v22  ;;  %v273_v54 = vld [vmem:[#allocation5 + $0x550] sm:$0xff]  ;;  %v142_v55 = vld [vmem:[#allocation5 + $0x138] sm:$0xff] }
  0xcd   :  { %955 = vmatpush2.msra.mxu1 %v555_v23  ;;  %885 = vmatprep.subr.mxu0 %v424_v24  ;;  %v270_v56 = vld [vmem:[#allocation5 + $0x538] sm:$0xff]  ;;  %v141_v57 = vld [vmem:[#allocation5 + $0x130] sm:$0xff] }
  0xce   :  { %956 = vmatprep.subr.mxu1 %v552_v25  ;;  %886 = vmatpush2.msra.mxu0 %v423_v27  ;;  %v269_v58 = vld [vmem:[#allocation5 + $0x530] sm:$0xff]  ;;  %v138_v59 = vld [vmem:[#allocation5 + $0x118] sm:$0xff] }
  0xcf   :  { %887 = vmatprep.mubr.f32.mxu0 %v1979_v26  ;;  %957 = vmatpush2.msra.mxu1 %v551_v28  ;;  %v266_v60 = vld [vmem:[#allocation5 + $0x518] sm:$0xff]  ;;  %v137_v61 = vld [vmem:[#allocation5 + $0x110] sm:$0xff] }
  0xd0   :  { %888 = vmatmul.mubr.f32.vlgmr.msra.gmra.mxu0 %v1972_v16  ;;  %958 = vmatprep.mubr.f32.mxu1 %v1983_v52  ;;  %v265_v63 = vld [vmem:[#allocation5 + $0x510] sm:$0xff]  ;;  %v134_v0 = vld [vmem:[#allocation5 + $0xf8] sm:$0xff] }
  0xd1   :  { %965 = vmatprep.subr.mxu0 %v166_v29  ;;  %1036 = vmatprep.subr.mxu1 %v294_v30  ;;  %v133_v2 = vld [vmem:[#allocation5 + $0xf0] sm:$0xff]  ;;  %v130_v5 = vld [vmem:[#allocation5 + $0xd8] sm:$0xff] }
  0xd2   :  { %959 = vmatmul.mubr.f32.vlgmr.msra.gmra.mxu1 %v1975_v21  ;;  %966 = vmatpush1.msra.mxu0 %v165_v31  ;;  %v261_v4 = vld [vmem:[#allocation5 + $0x4f0] sm:$0xff]  ;;  %v258_v6 = vld [vmem:[#allocation5 + $0x4d8] sm:$0xff] }
  0xd3   :  { %1037 = vmatpush1.msra.mxu1 %v293_v32  ;;  %967 = vmatprep.subr.mxu0 %v162_v33  ;;  %v129_v7 = vld [vmem:[#allocation5 + $0xd0] sm:$0xff]  ;;  %v254_v12 = vld [vmem:[#allocation5 + $0x4b8] sm:$0xff] }
  0xd4   :  { %1038 = vmatprep.subr.mxu1 %v290_v34  ;;  %968 = vmatpush1.msra.mxu0 %v161_v35  ;;  %v257_v9 = vld [vmem:[#allocation5 + $0x4d0] sm:$0xff]  ;;  %v122_v15 = vld [vmem:[#allocation5 + $0x98] sm:$0xff] }
  0xd5   :  { %1039 = vmatpush1.msra.mxu1 %v289_v36  ;;  %969 = vmatprep.subr.mxu0 %v158_v37  ;;  %v125_v13 = vld [vmem:[#allocation5 + $0xb0] sm:$0xff]  ;;  %v250_v17 = vld [vmem:[#allocation5 + $0x498] sm:$0xff] }
  0xd6   :  { %1040 = vmatprep.subr.mxu1 %v286_v38  ;;  %970 = vmatpush1.msra.mxu0 %v157_v39  ;;  %v253_v14 = vld [vmem:[#allocation5 + $0x4b0] sm:$0xff]  ;;  %v118_v20 = vld [vmem:[#allocation5 + $0x78] sm:$0xff] }
  0xd7   :  { %1041 = vmatpush1.msra.mxu1 %v285_v40  ;;  %971 = vmatprep.subr.mxu0 %v154_v42  ;;  %v121_v18 = vld [vmem:[#allocation5 + $0x90] sm:$0xff]  ;;  %v246_v22 = vld [vmem:[#allocation5 + $0x478] sm:$0xff] }
  0xd8   :  { %1042 = vmatprep.subr.mxu1 %v282_v43  ;;  %972 = vmatpush1.msra.mxu0 %v153_v44  ;;  %v249_v19 = vld [vmem:[#allocation5 + $0x490] sm:$0xff]  ;;  %v114_v25 = vld [vmem:[#allocation5 + $0x58] sm:$0xff] }
  0xd9   :  { %1043 = vmatpush1.msra.mxu1 %v281_v45  ;;  %973 = vmatprep.subr.mxu0 %v150_v46  ;;  %v117_v23 = vld [vmem:[#allocation5 + $0x70] sm:$0xff]  ;;  %v242_v27 = vld [vmem:[#allocation5 + $0x458] sm:$0xff] }
  0xda   :  { %1044 = vmatprep.subr.mxu1 %v278_v47  ;;  %974 = vmatpush1.msra.mxu0 %v149_v48  ;;  %v245_v24 = vld [vmem:[#allocation5 + $0x470] sm:$0xff]  ;;  %v110_v30 = vld [vmem:[#allocation5 + $0x38] sm:$0xff] }
  0xdb   :  { %1045 = vmatpush1.msra.mxu1 %v277_v49  ;;  %975 = vmatprep.subr.mxu0 %v146_v50  ;;  %v113_v28 = vld [vmem:[#allocation5 + $0x50] sm:$0xff]  ;;  %v238_v31 = vld [vmem:[#allocation5 + $0x438] sm:$0xff] }
  0xdc   :  { %1046 = vmatprep.subr.mxu1 %v274_v51  ;;  %976 = vmatpush1.msra.mxu0 %v145_v53  ;;  %v241_v29 = vld [vmem:[#allocation5 + $0x450] sm:$0xff]  ;;  %v106_v34 = vld [vmem:[#allocation5 + $0x18] sm:$0xff] }
  0xdd   :  { %1047 = vmatpush1.msra.mxu1 %v273_v54  ;;  %977 = vmatprep.subr.mxu0 %v142_v55  ;;  %v109_v32 = vld [vmem:[#allocation5 + $0x30] sm:$0xff]  ;;  %v234_v35 = vld [vmem:[#allocation5 + $0x418] sm:$0xff] }
  0xde   :  { %1048 = vmatprep.subr.mxu1 %v270_v56  ;;  %978 = vmatpush1.msra.mxu0 %v141_v57  ;;  %v237_v33 = vld [vmem:[#allocation5 + $0x430] sm:$0xff]  ;;  %v230_v38 = vld [vmem:[#allocation5 + $0x3f8] sm:$0xff] }
  0xdf   :  { %1049 = vmatpush1.msra.mxu1 %v269_v58  ;;  %979 = vmatprep.subr.mxu0 %v138_v59  ;;  %v105_v36 = vld [vmem:[#allocation5 + $0x10] sm:$0xff]  ;;  %v358_v39 = vld [vmem:[#allocation5 + $0x7f8] sm:$0xff] }
  0xe0   :  { %1050 = vmatprep.subr.mxu1 %v266_v60  ;;  %980 = vmatpush1.msra.mxu0 %v137_v61  ;;  %v233_v37 = vld [vmem:[#allocation5 + $0x410] sm:$0xff]  ;;  %v226_v43 = vld [vmem:[#allocation5 + $0x3d8] sm:$0xff] }
  0xe1   :  { %1051 = vmatpush1.msra.mxu1 %v265_v63  ;;  %981 = vmatprep.subr.mxu0 %v134_v0  ;;  %v229_v40 = vld [vmem:[#allocation5 + $0x3f0] sm:$0xff]  ;;  %v354_v44 = vld [vmem:[#allocation5 + $0x7d8] sm:$0xff] }
  0xe2   :  { %1052 = vmatprep.subr.mxu1 %v262_v1  ;;  %982 = vmatpush1.msra.mxu0 %v133_v2  ;;  %v357_v42 = vld [vmem:[#allocation5 + $0x7f0] sm:$0xff]  ;;  %v222_v47 = vld [vmem:[#allocation5 + $0x3b8] sm:$0xff] }
  0xe3   :  { %1053 = vmatpush1.msra.mxu1 %v261_v4  ;;  %983 = vmatprep.subr.mxu0 %v130_v5  ;;  %v225_v45 = vld [vmem:[#allocation5 + $0x3d0] sm:$0xff]  ;;  %v350_v48 = vld [vmem:[#allocation5 + $0x7b8] sm:$0xff] }
  0xe4   :  { %1054 = vmatprep.subr.mxu1 %v258_v6  ;;  %984 = vmatpush1.msra.mxu0 %v129_v7  ;;  %v353_v46 = vld [vmem:[#allocation5 + $0x7d0] sm:$0xff]  ;;  %v218_v51 = vld [vmem:[#allocation5 + $0x398] sm:$0xff] }
  0xe5   :  { %1055 = vmatpush1.msra.mxu1 %v257_v9  ;;  %985 = vmatprep.subr.mxu0 %v126_v10  ;;  %v221_v49 = vld [vmem:[#allocation5 + $0x3b0] sm:$0xff]  ;;  %v346_v53 = vld [vmem:[#allocation5 + $0x798] sm:$0xff] }
  0xe6   :  { %1056 = vmatprep.subr.mxu1 %v254_v12  ;;  %986 = vmatpush1.msra.mxu0 %v125_v13  ;;  %v349_v50 = vld [vmem:[#allocation5 + $0x7b0] sm:$0xff]  ;;  %v214_v56 = vld [vmem:[#allocation5 + $0x378] sm:$0xff] }
  0xe7   :  { %1057 = vmatpush1.msra.mxu1 %v253_v14  ;;  %987 = vmatprep.subr.mxu0 %v122_v15  ;;  %v217_v54 = vld [vmem:[#allocation5 + $0x390] sm:$0xff]  ;;  %v342_v57 = vld [vmem:[#allocation5 + $0x778] sm:$0xff] }
  0xe8   :  { %1058 = vmatprep.subr.mxu1 %v250_v17  ;;  %988 = vmatpush1.msra.mxu0 %v121_v18  ;;  %v345_v55 = vld [vmem:[#allocation5 + $0x790] sm:$0xff]  ;;  %v210_v60 = vld [vmem:[#allocation5 + $0x358] sm:$0xff] }
  0xe9   :  { %1059 = vmatpush1.msra.mxu1 %v249_v19  ;;  %989 = vmatprep.subr.mxu0 %v118_v20  ;;  %v213_v58 = vld [vmem:[#allocation5 + $0x370] sm:$0xff]  ;;  %v338_v61 = vld [vmem:[#allocation5 + $0x758] sm:$0xff] }
  0xea   :  { %1060 = vmatprep.subr.mxu1 %v246_v22  ;;  %990 = vmatpush1.msra.mxu0 %v117_v23  ;;  %v341_v59 = vld [vmem:[#allocation5 + $0x770] sm:$0xff]  ;;  %v206_v1 = vld [vmem:[#allocation5 + $0x338] sm:$0xff] }
  0xeb   :  { %1061 = vmatpush1.msra.mxu1 %v245_v24  ;;  %991 = vmatprep.subr.mxu0 %v114_v25  ;;  %v209_v63 = vld [vmem:[#allocation5 + $0x350] sm:$0xff]  ;;  %v334_v2 = vld [vmem:[#allocation5 + $0x738] sm:$0xff] }
  0xec   :  { %1062 = vmatprep.subr.mxu1 %v242_v27  ;;  %992 = vmatpush1.msra.mxu0 %v113_v28  ;;  %v337_v0 = vld [vmem:[#allocation5 + $0x750] sm:$0xff]  ;;  %v202_v6 = vld [vmem:[#allocation5 + $0x318] sm:$0xff] }
  0xed   :  { %1063 = vmatpush1.msra.mxu1 %v241_v29  ;;  %993 = vmatprep.subr.mxu0 %v110_v30  ;;  %v205_v4 = vld [vmem:[#allocation5 + $0x330] sm:$0xff]  ;;  %v330_v7 = vld [vmem:[#allocation5 + $0x718] sm:$0xff] }
  0xee   :  { %1064 = vmatprep.subr.mxu1 %v238_v31  ;;  %994 = vmatpush1.msra.mxu0 %v109_v32  ;;  %v333_v5 = vld [vmem:[#allocation5 + $0x730] sm:$0xff]  ;;  %v198_v12 = vld [vmem:[#allocation5 + $0x2f8] sm:$0xff] }
  0xef   :  { %1065 = vmatpush1.msra.mxu1 %v237_v33  ;;  %995 = vmatprep.subr.mxu0 %v106_v34  ;;  %v201_v9 = vld [vmem:[#allocation5 + $0x310] sm:$0xff]  ;;  %v326_v13 = vld [vmem:[#allocation5 + $0x6f8] sm:$0xff] }
  0xf0   :  { %1066 = vmatprep.subr.mxu1 %v234_v35  ;;  %996 = vmatpush1.msra.mxu0 %v105_v36  ;;  %v329_v10 = vld [vmem:[#allocation5 + $0x710] sm:$0xff]  ;;  %v194_v17 = vld [vmem:[#allocation5 + $0x2d8] sm:$0xff] }
  0xf1   :  { %1067 = vmatpush1.msra.mxu1 %v233_v37  ;;  %997 = vmatprep.subr.mxu0 %v230_v38  ;;  %v197_v14 = vld [vmem:[#allocation5 + $0x2f0] sm:$0xff]  ;;  %v322_v18 = vld [vmem:[#allocation5 + $0x6d8] sm:$0xff] }
  0xf2   :  { %1068 = vmatprep.subr.mxu1 %v358_v39  ;;  %998 = vmatpush2.msra.mxu0 %v229_v40  ;;  %v325_v15 = vld [vmem:[#allocation5 + $0x6f0] sm:$0xff]  ;;  %v190_v22 = vld [vmem:[#allocation5 + $0x2b8] sm:$0xff] }
  0xf3   :  { %1069 = vmatpush2.msra.mxu1 %v357_v42  ;;  %999 = vmatprep.subr.mxu0 %v226_v43  ;;  %v193_v19 = vld [vmem:[#allocation5 + $0x2d0] sm:$0xff]  ;;  %v318_v23 = vld [vmem:[#allocation5 + $0x6b8] sm:$0xff] }
  0xf4   :  { %1070 = vmatprep.subr.mxu1 %v354_v44  ;;  %1000 = vmatpush2.msra.mxu0 %v225_v45  ;;  %v321_v20 = vld [vmem:[#allocation5 + $0x6d0] sm:$0xff]  ;;  %v186_v27 = vld [vmem:[#allocation5 + $0x298] sm:$0xff] }
  0xf5   :  { %1071 = vmatpush2.msra.mxu1 %v353_v46  ;;  %1001 = vmatprep.subr.mxu0 %v222_v47  ;;  %v189_v24 = vld [vmem:[#allocation5 + $0x2b0] sm:$0xff]  ;;  %v314_v28 = vld [vmem:[#allocation5 + $0x698] sm:$0xff] }
  0xf6   :  { %1072 = vmatprep.subr.mxu1 %v350_v48  ;;  %1002 = vmatpush2.msra.mxu0 %v221_v49  ;;  %v317_v25 = vld [vmem:[#allocation5 + $0x6b0] sm:$0xff]  ;;  %v182_v31 = vld [vmem:[#allocation5 + $0x278] sm:$0xff] }
  0xf7   :  { %1073 = vmatpush2.msra.mxu1 %v349_v50  ;;  %1003 = vmatprep.subr.mxu0 %v218_v51  ;;  %v185_v29 = vld [vmem:[#allocation5 + $0x290] sm:$0xff]  ;;  %v310_v32 = vld [vmem:[#allocation5 + $0x678] sm:$0xff] }
  0xf8   :  { %1074 = vmatprep.subr.mxu1 %v346_v53  ;;  %1004 = vmatpush2.msra.mxu0 %v217_v54  ;;  %v313_v30 = vld [vmem:[#allocation5 + $0x690] sm:$0xff]  ;;  %v178_v35 = vld [vmem:[#allocation5 + $0x258] sm:$0xff] }
  0xf9   :  { %1075 = vmatpush2.msra.mxu1 %v345_v55  ;;  %1005 = vmatprep.subr.mxu0 %v214_v56  ;;  %v181_v33 = vld [vmem:[#allocation5 + $0x270] sm:$0xff]  ;;  %v306_v36 = vld [vmem:[#allocation5 + $0x658] sm:$0xff] }
  0xfa   :  { %1076 = vmatprep.subr.mxu1 %v342_v57  ;;  %1006 = vmatpush2.msra.mxu0 %v213_v58  ;;  %v309_v34 = vld [vmem:[#allocation5 + $0x670] sm:$0xff]  ;;  %v174_v39 = vld [vmem:[#allocation5 + $0x238] sm:$0xff] }
  0xfb   :  { %1077 = vmatpush2.msra.mxu1 %v341_v59  ;;  %1007 = vmatprep.subr.mxu0 %v210_v60  ;;  %v177_v37 = vld [vmem:[#allocation5 + $0x250] sm:$0xff]  ;;  %v302_v40 = vld [vmem:[#allocation5 + $0x638] sm:$0xff] }
  0xfc   :  { %1078 = vmatprep.subr.mxu1 %v338_v61  ;;  %1008 = vmatpush2.msra.mxu0 %v209_v63  ;;  %v305_v38 = vld [vmem:[#allocation5 + $0x650] sm:$0xff]  ;;  %v170_v44 = vld [vmem:[#allocation5 + $0x218] sm:$0xff] }
  0xfd   :  { %1079 = vmatpush2.msra.mxu1 %v337_v0  ;;  %1009 = vmatprep.subr.mxu0 %v206_v1  ;;  %v173_v42 = vld [vmem:[#allocation5 + $0x230] sm:$0xff]  ;;  %v298_v45 = vld [vmem:[#allocation5 + $0x618] sm:$0xff] }
  0xfe   :  { %1080 = vmatprep.subr.mxu1 %v334_v2  ;;  %1010 = vmatpush2.msra.mxu0 %v205_v4  ;;  %v301_v43 = vld [vmem:[#allocation5 + $0x630] sm:$0xff]  ;;  %v422_v48 = vld [vmem:[#allocation5 + $0x9f8] sm:$0xff] }
  0xff   :  { %1081 = vmatpush2.msra.mxu1 %v333_v5  ;;  %1011 = vmatprep.subr.mxu0 %v202_v6  ;;  %v169_v46 = vld [vmem:[#allocation5 + $0x210] sm:$0xff]  ;;  %v550_v49 = vld [vmem:[#allocation5 + $0xdf8] sm:$0xff] }
 0x100   :  { %1082 = vmatprep.subr.mxu1 %v330_v7  ;;  %1012 = vmatpush2.msra.mxu0 %v201_v9  ;;  %v297_v47 = vld [vmem:[#allocation5 + $0x610] sm:$0xff]  ;;  %v418_v53 = vld [vmem:[#allocation5 + $0x9d8] sm:$0xff] }
 0x101   :  { %1083 = vmatpush2.msra.mxu1 %v329_v10  ;;  %1013 = vmatprep.subr.mxu0 %v198_v12  ;;  %v421_v50 = vld [vmem:[#allocation5 + $0x9f0] sm:$0xff]  ;;  %v546_v54 = vld [vmem:[#allocation5 + $0xdd8] sm:$0xff] }
 0x102   :  { %1084 = vmatprep.subr.mxu1 %v326_v13  ;;  %1014 = vmatpush2.msra.mxu0 %v197_v14  ;;  %v549_v51 = vld [vmem:[#allocation5 + $0xdf0] sm:$0xff]  ;;  %v414_v57 = vld [vmem:[#allocation5 + $0x9b8] sm:$0xff] }
 0x103   :  { %1085 = vmatpush2.msra.mxu1 %v325_v15  ;;  %1015 = vmatprep.subr.mxu0 %v194_v17  ;;  %v417_v55 = vld [vmem:[#allocation5 + $0x9d0] sm:$0xff]  ;;  %v410_v59 = vld [vmem:[#allocation5 + $0x998] sm:$0xff] }
 0x104   :  { %1086 = vmatprep.subr.mxu1 %v322_v18  ;;  %1016 = vmatpush2.msra.mxu0 %v193_v19  ;;  %v545_v56 = vld [vmem:[#allocation5 + $0xdd0] sm:$0xff]  ;;  %v534_v63 = vld [vmem:[#allocation5 + $0xd78] sm:$0xff] }
 0x105   :  { %1087 = vmatpush2.msra.mxu1 %v321_v20  ;;  %1017 = vmatprep.subr.mxu0 %v190_v22  ;;  %v413_v58 = vld [vmem:[#allocation5 + $0x9b0] sm:$0xff]  ;;  %v402_v2 = vld [vmem:[#allocation5 + $0x958] sm:$0xff] }
 0x106   :  { %1088 = vmatprep.subr.mxu1 %v318_v23  ;;  %1018 = vmatpush2.msra.mxu0 %v189_v24  ;;  %v409_v60 = vld [vmem:[#allocation5 + $0x990] sm:$0xff]  ;;  %v530_v4 = vld [vmem:[#allocation5 + $0xd58] sm:$0xff] }
 0x107   :  { %1089 = vmatpush2.msra.mxu1 %v317_v25  ;;  %1019 = vmatprep.subr.mxu0 %v186_v27  ;;  %v537_v61 = vld [vmem:[#allocation5 + $0xd90] sm:$0xff]  ;;  %v398_v7 = vld [vmem:[#allocation5 + $0x938] sm:$0xff] }
 0x108   :  { %1090 = vmatprep.subr.mxu1 %v314_v28  ;;  %1020 = vmatpush2.msra.mxu0 %v185_v29  ;;  %v405_v0 = vld [vmem:[#allocation5 + $0x970] sm:$0xff]  ;;  %v526_v9 = vld [vmem:[#allocation5 + $0xd38] sm:$0xff] }
 0x109   :  { %1091 = vmatpush2.msra.mxu1 %v313_v30  ;;  %1021 = vmatprep.subr.mxu0 %v182_v31  ;;  %v533_v1 = vld [vmem:[#allocation5 + $0xd70] sm:$0xff]  ;;  %v394_v13 = vld [vmem:[#allocation5 + $0x918] sm:$0xff] }
 0x10a   :  { %1092 = vmatprep.subr.mxu1 %v310_v32  ;;  %1022 = vmatpush2.msra.mxu0 %v181_v33  ;;  %v401_v5 = vld [vmem:[#allocation5 + $0x950] sm:$0xff]  ;;  %v522_v14 = vld [vmem:[#allocation5 + $0xd18] sm:$0xff] }
 0x10b   :  { %1093 = vmatpush2.msra.mxu1 %v309_v34  ;;  %1023 = vmatprep.subr.mxu0 %v178_v35  ;;  %v529_v6 = vld [vmem:[#allocation5 + $0xd50] sm:$0xff]  ;;  %v390_v18 = vld [vmem:[#allocation5 + $0x8f8] sm:$0xff] }
 0x10c   :  { %1094 = vmatprep.subr.mxu1 %v306_v36  ;;  %1024 = vmatpush2.msra.mxu0 %v177_v37  ;;  %v397_v10 = vld [vmem:[#allocation5 + $0x930] sm:$0xff]  ;;  %v518_v19 = vld [vmem:[#allocation5 + $0xcf8] sm:$0xff] }
 0x10d   :  { %1095 = vmatpush2.msra.mxu1 %v305_v38  ;;  %1025 = vmatprep.subr.mxu0 %v174_v39  ;;  %v525_v12 = vld [vmem:[#allocation5 + $0xd30] sm:$0xff]  ;;  %v386_v23 = vld [vmem:[#allocation5 + $0x8d8] sm:$0xff] }
 0x10e   :  { %1096 = vmatprep.subr.mxu1 %v302_v40  ;;  %1026 = vmatpush2.msra.mxu0 %v173_v42  ;;  %v393_v15 = vld [vmem:[#allocation5 + $0x910] sm:$0xff]  ;;  %v514_v24 = vld [vmem:[#allocation5 + $0xcd8] sm:$0xff] }
 0x10f   :  { %1097 = vmatpush2.msra.mxu1 %v301_v43  ;;  %1027 = vmatprep.subr.mxu0 %v170_v44  ;;  %v521_v17 = vld [vmem:[#allocation5 + $0xd10] sm:$0xff]  ;;  %v382_v28 = vld [vmem:[#allocation5 + $0x8b8] sm:$0xff] }
 0x110   :  { %1098 = vmatprep.subr.mxu1 %v298_v45  ;;  %1028 = vmatpush2.msra.mxu0 %v169_v46  ;;  %v389_v20 = vld [vmem:[#allocation5 + $0x8f0] sm:$0xff]  ;;  %v510_v29 = vld [vmem:[#allocation5 + $0xcb8] sm:$0xff] }
 0x111   :  { %1029 = vmatprep.mubr.f32.mxu0 %v1961_v8  ;;  %1099 = vmatpush2.msra.mxu1 %v297_v47  ;;  %v542_v8 = vld [vmem:[#allocation5 + $0xdb8] sm:$0xff]  ;;  %v517_v22 = vld [vmem:[#allocation5 + $0xcf0] sm:$0xff] }
 0x112   :  { %1030 = vmatmul.mubr.f32.vlgmr.msra.gmra.mxu0 %v1954_v62  ;;  %1100 = vmatprep.mubr.f32.mxu1 %v1965_v11  ;;  %v541_v62 = vld [vmem:[#allocation5 + $0xdb0] sm:$0xff]  ;;  %v538_v11 = vld [vmem:[#allocation5 + $0xd98] sm:$0xff] }
 0x113   :  { %1107 = vmatprep.subr.mxu0 %v422_v48  ;;  %1178 = vmatprep.subr.mxu1 %v550_v49  ;;  %v385_v25 = vld [vmem:[#allocation5 + $0x8d0] sm:$0xff]  ;;  %v378_v32 = vld [vmem:[#allocation5 + $0x898] sm:$0xff] }
 0x114   :  { %1101 = vmatmul.mubr.f32.vlgmr.msra.gmra.mxu1 %v1957_v3  ;;  %1108 = vmatpush1.msra.mxu0 %v421_v50  ;;  %v406_v3 = vld [vmem:[#allocation5 + $0x978] sm:$0xff]  ;;  %v513_v27 = vld [vmem:[#allocation5 + $0xcd0] sm:$0xff] }
 0x115   :  { %1179 = vmatpush1.msra.mxu1 %v549_v51  ;;  %1109 = vmatprep.subr.mxu0 %v418_v53  ;;  %v381_v30 = vld [vmem:[#allocation5 + $0x8b0] sm:$0xff]  ;;  %v506_v33 = vld [vmem:[#allocation5 + $0xc98] sm:$0xff] }
 0x116   :  { %1180 = vmatprep.subr.mxu1 %v546_v54  ;;  %1110 = vmatpush1.msra.mxu0 %v417_v55  ;;  %v509_v31 = vld [vmem:[#allocation5 + $0xcb0] sm:$0xff]  ;;  %v374_v36 = vld [vmem:[#allocation5 + $0x878] sm:$0xff] }
 0x117   :  { %1181 = vmatpush1.msra.mxu1 %v545_v56  ;;  %1111 = vmatprep.subr.mxu0 %v414_v57  ;;  %v377_v34 = vld [vmem:[#allocation5 + $0x890] sm:$0xff]  ;;  %v502_v37 = vld [vmem:[#allocation5 + $0xc78] sm:$0xff] }
 0x118   :  { %1182 = vmatprep.subr.mxu1 %v542_v8  ;;  %1112 = vmatpush1.msra.mxu0 %v413_v58  ;;  %v505_v35 = vld [vmem:[#allocation5 + $0xc90] sm:$0xff]  ;;  %v370_v40 = vld [vmem:[#allocation5 + $0x858] sm:$0xff] }
 0x119   :  { %1183 = vmatpush1.msra.mxu1 %v541_v62  ;;  %1113 = vmatprep.subr.mxu0 %v410_v59  ;;  %v373_v38 = vld [vmem:[#allocation5 + $0x870] sm:$0xff]  ;;  %v498_v42 = vld [vmem:[#allocation5 + $0xc58] sm:$0xff] }
 0x11a   :  { %1184 = vmatprep.subr.mxu1 %v538_v11  ;;  %1114 = vmatpush1.msra.mxu0 %v409_v60  ;;  %v501_v39 = vld [vmem:[#allocation5 + $0xc70] sm:$0xff]  ;;  %v366_v45 = vld [vmem:[#allocation5 + $0x838] sm:$0xff] }
 0x11b   :  { %1185 = vmatpush1.msra.mxu1 %v537_v61  ;;  %1115 = vmatprep.subr.mxu0 %v406_v3  ;;  %v369_v43 = vld [vmem:[#allocation5 + $0x850] sm:$0xff]  ;;  %v494_v46 = vld [vmem:[#allocation5 + $0xc38] sm:$0xff] }
 0x11c   :  { %1186 = vmatprep.subr.mxu1 %v534_v63  ;;  %1116 = vmatpush1.msra.mxu0 %v405_v0  ;;  %v497_v44 = vld [vmem:[#allocation5 + $0xc50] sm:$0xff]  ;;  %v362_v49 = vld [vmem:[#allocation5 + $0x818] sm:$0xff] }
 0x11d   :  { %1187 = vmatpush1.msra.mxu1 %v533_v1  ;;  %1117 = vmatprep.subr.mxu0 %v402_v2  ;;  %v365_v47 = vld [vmem:[#allocation5 + $0x830] sm:$0xff]  ;;  %v490_v50 = vld [vmem:[#allocation5 + $0xc18] sm:$0xff] }
 0x11e   :  { %1188 = vmatprep.subr.mxu1 %v530_v4  ;;  %1118 = vmatpush1.msra.mxu0 %v401_v5  ;;  %v493_v48 = vld [vmem:[#allocation5 + $0xc30] sm:$0xff]  ;;  %v486_v54 = vld [vmem:[#allocation5 + $0xbf8] sm:$0xff] }
 0x11f   :  { %1189 = vmatpush1.msra.mxu1 %v529_v6  ;;  %1119 = vmatprep.subr.mxu0 %v398_v7  ;;  %v361_v51 = vld [vmem:[#allocation5 + $0x810] sm:$0xff]  ;;  %v614_v55 = vld [vmem:[#allocation5 + $0xff8] sm:$0xff] }
 0x120   :  { %1190 = vmatprep.subr.mxu1 %v526_v9  ;;  %1120 = vmatpush1.msra.mxu0 %v397_v10  ;;  %v489_v53 = vld [vmem:[#allocation5 + $0xc10] sm:$0xff]  ;;  %v482_v8 = vld [vmem:[#allocation5 + $0xbd8] sm:$0xff] }
 0x121   :  { %1191 = vmatpush1.msra.mxu1 %v525_v12  ;;  %1121 = vmatprep.subr.mxu0 %v394_v13  ;;  %v485_v56 = vld [vmem:[#allocation5 + $0xbf0] sm:$0xff]  ;;  %v610_v58 = vld [vmem:[#allocation5 + $0xfd8] sm:$0xff] }
 0x122   :  { %1192 = vmatprep.subr.mxu1 %v522_v14  ;;  %1122 = vmatpush1.msra.mxu0 %v393_v15  ;;  %v613_v57 = vld [vmem:[#allocation5 + $0xff0] sm:$0xff]  ;;  %v478_v11 = vld [vmem:[#allocation5 + $0xbb8] sm:$0xff] }
 0x123   :  { %1193 = vmatpush1.msra.mxu1 %v521_v17  ;;  %1123 = vmatprep.subr.mxu0 %v390_v18  ;;  %v481_v62 = vld [vmem:[#allocation5 + $0xbd0] sm:$0xff]  ;;  %v606_v60 = vld [vmem:[#allocation5 + $0xfb8] sm:$0xff] }
 0x124   :  { %1194 = vmatprep.subr.mxu1 %v518_v19  ;;  %1124 = vmatpush1.msra.mxu0 %v389_v20  ;;  %v609_v59 = vld [vmem:[#allocation5 + $0xfd0] sm:$0xff]  ;;  %v474_v63 = vld [vmem:[#allocation5 + $0xb98] sm:$0xff] }
 0x125   :  { %1195 = vmatpush1.msra.mxu1 %v517_v22  ;;  %1125 = vmatprep.subr.mxu0 %v386_v23  ;;  %v477_v61 = vld [vmem:[#allocation5 + $0xbb0] sm:$0xff]  ;;  %v602_v0 = vld [vmem:[#allocation5 + $0xf98] sm:$0xff] }
 0x126   :  { %1196 = vmatprep.subr.mxu1 %v514_v24  ;;  %1126 = vmatpush1.msra.mxu0 %v385_v25  ;;  %v605_v3 = vld [vmem:[#allocation5 + $0xfb0] sm:$0xff]  ;;  %v470_v4 = vld [vmem:[#allocation5 + $0xb78] sm:$0xff] }
 0x127   :  { %1197 = vmatpush1.msra.mxu1 %v513_v27  ;;  %1127 = vmatprep.subr.mxu0 %v382_v28  ;;  %v473_v1 = vld [vmem:[#allocation5 + $0xb90] sm:$0xff]  ;;  %v598_v5 = vld [vmem:[#allocation5 + $0xf78] sm:$0xff] }
 0x128   :  { %1198 = vmatprep.subr.mxu1 %v510_v29  ;;  %1128 = vmatpush1.msra.mxu0 %v381_v30  ;;  %v601_v2 = vld [vmem:[#allocation5 + $0xf90] sm:$0xff]  ;;  %v466_v9 = vld [vmem:[#allocation5 + $0xb58] sm:$0xff] }
 0x129   :  { %1199 = vmatpush1.msra.mxu1 %v509_v31  ;;  %1129 = vmatprep.subr.mxu0 %v378_v32  ;;  %v469_v6 = vld [vmem:[#allocation5 + $0xb70] sm:$0xff]  ;;  %v594_v10 = vld [vmem:[#allocation5 + $0xf58] sm:$0xff] }
 0x12a   :  { %1200 = vmatprep.subr.mxu1 %v506_v33  ;;  %1130 = vmatpush1.msra.mxu0 %v377_v34  ;;  %v597_v7 = vld [vmem:[#allocation5 + $0xf70] sm:$0xff]  ;;  %v462_v14 = vld [vmem:[#allocation5 + $0xb38] sm:$0xff] }
 0x12b   :  { %1201 = vmatpush1.msra.mxu1 %v505_v35  ;;  %1131 = vmatprep.subr.mxu0 %v374_v36  ;;  %v465_v12 = vld [vmem:[#allocation5 + $0xb50] sm:$0xff]  ;;  %v590_v15 = vld [vmem:[#allocation5 + $0xf38] sm:$0xff] }
 0x12c   :  { %1202 = vmatprep.subr.mxu1 %v502_v37  ;;  %1132 = vmatpush1.msra.mxu0 %v373_v38  ;;  %v593_v13 = vld [vmem:[#allocation5 + $0xf50] sm:$0xff]  ;;  %v458_v19 = vld [vmem:[#allocation5 + $0xb18] sm:$0xff] }
 0x12d   :  { %1203 = vmatpush1.msra.mxu1 %v501_v39  ;;  %1133 = vmatprep.subr.mxu0 %v370_v40  ;;  %v461_v17 = vld [vmem:[#allocation5 + $0xb30] sm:$0xff]  ;;  %v586_v20 = vld [vmem:[#allocation5 + $0xf18] sm:$0xff] }
 0x12e   :  { %1204 = vmatprep.subr.mxu1 %v498_v42  ;;  %1134 = vmatpush1.msra.mxu0 %v369_v43  ;;  %v589_v18 = vld [vmem:[#allocation5 + $0xf30] sm:$0xff]  ;;  %v454_v24 = vld [vmem:[#allocation5 + $0xaf8] sm:$0xff] }
 0x12f   :  { %1205 = vmatpush1.msra.mxu1 %v497_v44  ;;  %1135 = vmatprep.subr.mxu0 %v366_v45  ;;  %v457_v22 = vld [vmem:[#allocation5 + $0xb10] sm:$0xff]  ;;  %v582_v25 = vld [vmem:[#allocation5 + $0xef8] sm:$0xff] }
 0x130   :  { %1206 = vmatprep.subr.mxu1 %v494_v46  ;;  %1136 = vmatpush1.msra.mxu0 %v365_v47  ;;  %v585_v23 = vld [vmem:[#allocation5 + $0xf10] sm:$0xff]  ;;  %v450_v29 = vld [vmem:[#allocation5 + $0xad8] sm:$0xff] }
 0x131   :  { %1207 = vmatpush1.msra.mxu1 %v493_v48  ;;  %1137 = vmatprep.subr.mxu0 %v362_v49  ;;  %v453_v27 = vld [vmem:[#allocation5 + $0xaf0] sm:$0xff]  ;;  %v578_v30 = vld [vmem:[#allocation5 + $0xed8] sm:$0xff] }
 0x132   :  { %1208 = vmatprep.subr.mxu1 %v490_v50  ;;  %1138 = vmatpush1.msra.mxu0 %v361_v51  ;;  %v581_v28 = vld [vmem:[#allocation5 + $0xef0] sm:$0xff]  ;;  %v446_v33 = vld [vmem:[#allocation5 + $0xab8] sm:$0xff] }
 0x133   :  { %1209 = vmatpush1.msra.mxu1 %v489_v53  ;;  %1139 = vmatprep.subr.mxu0 %v486_v54  ;;  %v449_v31 = vld [vmem:[#allocation5 + $0xad0] sm:$0xff]  ;;  %v574_v34 = vld [vmem:[#allocation5 + $0xeb8] sm:$0xff] }
 0x134   :  { %1210 = vmatprep.subr.mxu1 %v614_v55  ;;  %1140 = vmatpush2.msra.mxu0 %v485_v56  ;;  %v577_v32 = vld [vmem:[#allocation5 + $0xed0] sm:$0xff]  ;;  %v442_v37 = vld [vmem:[#allocation5 + $0xa98] sm:$0xff] }
 0x135   :  { %1211 = vmatpush2.msra.mxu1 %v613_v57  ;;  %1141 = vmatprep.subr.mxu0 %v482_v8  ;;  %v445_v35 = vld [vmem:[#allocation5 + $0xab0] sm:$0xff]  ;;  %v570_v38 = vld [vmem:[#allocation5 + $0xe98] sm:$0xff] }
 0x136   :  { %1212 = vmatprep.subr.mxu1 %v610_v58  ;;  %1142 = vmatpush2.msra.mxu0 %v481_v62  ;;  %v573_v36 = vld [vmem:[#allocation5 + $0xeb0] sm:$0xff]  ;;  %v438_v42 = vld [vmem:[#allocation5 + $0xa78] sm:$0xff] }
 0x137   :  { %1213 = vmatpush2.msra.mxu1 %v609_v59  ;;  %1143 = vmatprep.subr.mxu0 %v478_v11  ;;  %v441_v39 = vld [vmem:[#allocation5 + $0xa90] sm:$0xff]  ;;  %v566_v43 = vld [vmem:[#allocation5 + $0xe78] sm:$0xff]  ;;  %v1289_v11 = vld [vmem:[#allocation8 + $0xe0] sm:$0xff] }
 0x138   :  { %1214 = vmatprep.subr.mxu1 %v606_v60  ;;  %1144 = vmatpush2.msra.mxu0 %v477_v61  ;;  %v569_v40 = vld [vmem:[#allocation5 + $0xe90] sm:$0xff]  ;;  %v434_v46 = vld [vmem:[#allocation5 + $0xa58] sm:$0xff] }
 0x139   :  { %1215 = vmatpush2.msra.mxu1 %v605_v3  ;;  %1145 = vmatprep.subr.mxu0 %v474_v63  ;;  %v437_v44 = vld [vmem:[#allocation5 + $0xa70] sm:$0xff]  ;;  %v562_v47 = vld [vmem:[#allocation5 + $0xe58] sm:$0xff] }
 0x13a   :  { %1216 = vmatprep.subr.mxu1 %v602_v0  ;;  %1146 = vmatpush2.msra.mxu0 %v473_v1  ;;  %v565_v45 = vld [vmem:[#allocation5 + $0xe70] sm:$0xff]  ;;  %v430_v50 = vld [vmem:[#allocation5 + $0xa38] sm:$0xff] }
 0x13b   :  { %1217 = vmatpush2.msra.mxu1 %v601_v2  ;;  %1147 = vmatprep.subr.mxu0 %v470_v4  ;;  %v433_v48 = vld [vmem:[#allocation5 + $0xa50] sm:$0xff]  ;;  %v558_v51 = vld [vmem:[#allocation5 + $0xe38] sm:$0xff] }
 0x13c   :  { %1218 = vmatprep.subr.mxu1 %v598_v5  ;;  %1148 = vmatpush2.msra.mxu0 %v469_v6  ;;  %v561_v49 = vld [vmem:[#allocation5 + $0xe50] sm:$0xff]  ;;  %v426_v55 = vld [vmem:[#allocation5 + $0xa18] sm:$0xff]  ;;  %v1349_v6 = vld [vmem:[#allocation8 + $0x2c0] sm:$0xff] }
 0x13d   :  { %1219 = vmatpush2.msra.mxu1 %v597_v7  ;;  %1149 = vmatprep.subr.mxu0 %v466_v9  ;;  %v429_v53 = vld [vmem:[#allocation5 + $0xa30] sm:$0xff]  ;;  %v554_v56 = vld [vmem:[#allocation5 + $0xe18] sm:$0xff] }
 0x13e   :  { %1220 = vmatprep.subr.mxu1 %v594_v10  ;;  %1150 = vmatpush2.msra.mxu0 %v465_v12  ;;  %v557_v54 = vld [vmem:[#allocation5 + $0xe30] sm:$0xff]  ;;  %v1292_v58 = vld [vmem:[#allocation8 + $0xf8] sm:$0xff]  ;;  %v1281_v10 = vld [vmem:[#allocation8 + $0xa0] sm:$0xff] }
 0x13f   :  { %1221 = vmatpush2.msra.mxu1 %v593_v13  ;;  %1151 = vmatprep.subr.mxu0 %v462_v14  ;;  %v425_v57 = vld [vmem:[#allocation5 + $0xa10] sm:$0xff]  ;;  %v1288_v60 = vld [vmem:[#allocation8 + $0xd8] sm:$0xff] }
 0x140   :  { %1222 = vmatprep.subr.mxu1 %v590_v15  ;;  %1152 = vmatpush2.msra.mxu0 %v461_v17  ;;  %v553_v8 = vld [vmem:[#allocation5 + $0xe10] sm:$0xff]  ;;  %v1356_v61 = vld [vmem:[#allocation8 + $0x2f8] sm:$0xff]  ;;  %v1345_v17 = vld [vmem:[#allocation8 + $0x2a0] sm:$0xff] }
 0x141   :  { %1223 = vmatpush2.msra.mxu1 %v589_v18  ;;  %1153 = vmatprep.subr.mxu0 %v458_v19  ;;  %v1291_v62 = vld [vmem:[#allocation8 + $0xf0] sm:$0xff]  ;;  %v1290_v59 = vld [vmem:[#allocation8 + $0xe8] sm:$0xff]  ;;  %v1284_v2 = vld [vmem:[#allocation8 + $0xb8] sm:$0xff] }
 0x142   :  { %1224 = vmatprep.subr.mxu1 %v586_v20  ;;  %1154 = vmatpush2.msra.mxu0 %v457_v22  ;;  %v1355_v3 = vld [vmem:[#allocation8 + $0x2f0] sm:$0xff]  ;;  %v1354_v63 = vld [vmem:[#allocation8 + $0x2e8] sm:$0xff]  ;;  %v1348_v9 = vld [vmem:[#allocation8 + $0x2b8] sm:$0xff] }
 0x143   :  { %1225 = vmatpush2.msra.mxu1 %v585_v23  ;;  %1155 = vmatprep.subr.mxu0 %v454_v24  ;;  %v1287_v0 = vld [vmem:[#allocation8 + $0xd0] sm:$0xff]  ;;  %v1286_v1 = vld [vmem:[#allocation8 + $0xc8] sm:$0xff]  ;;  %v1280_v13 = vld [vmem:[#allocation8 + $0x98] sm:$0xff] }
 0x144   :  { %1226 = vmatprep.subr.mxu1 %v582_v25  ;;  %1156 = vmatpush2.msra.mxu0 %v453_v27  ;;  %v1350_v4 = vld [vmem:[#allocation8 + $0x2c8] sm:$0xff]  ;;  %v1283_v5 = vld [vmem:[#allocation8 + $0xb0] sm:$0xff]  ;;  %v1344_v19 = vld [vmem:[#allocation8 + $0x298] sm:$0xff] }
 0x145   :  { %1227 = vmatpush2.msra.mxu1 %v581_v28  ;;  %1157 = vmatprep.subr.mxu0 %v450_v29  ;;  %v1282_v7 = vld [vmem:[#allocation8 + $0xa8] sm:$0xff]  ;;  %v1347_v12 = vld [vmem:[#allocation8 + $0x2b0] sm:$0xff]  ;;  %v1277_v20 = vld [vmem:[#allocation8 + $0x80] sm:$0xff] }
 0x146   :  { %1228 = vmatprep.subr.mxu1 %v578_v30  ;;  %1158 = vmatpush2.msra.mxu0 %v449_v31  ;;  %v1346_v14 = vld [vmem:[#allocation8 + $0x2a8] sm:$0xff]  ;;  %v1279_v15 = vld [vmem:[#allocation8 + $0x90] sm:$0xff]  ;;  %v1276_v23 = vld [vmem:[#allocation8 + $0x78] sm:$0xff] }
 0x147   :  { %1229 = vmatpush2.msra.mxu1 %v577_v32  ;;  %1159 = vmatprep.subr.mxu0 %v446_v33  ;;  %v1278_v18 = vld [vmem:[#allocation8 + $0x88] sm:$0xff]  ;;  %v1343_v22 = vld [vmem:[#allocation8 + $0x290] sm:$0xff]  ;;  %v1341_v27 = vld [vmem:[#allocation8 + $0x280] sm:$0xff] }
 0x148   :  { %1230 = vmatprep.subr.mxu1 %v574_v34  ;;  %1160 = vmatpush2.msra.mxu0 %v445_v35  ;;  %v1342_v24 = vld [vmem:[#allocation8 + $0x288] sm:$0xff]  ;;  %v1275_v25 = vld [vmem:[#allocation8 + $0x70] sm:$0xff]  ;;  %v1340_v29 = vld [vmem:[#allocation8 + $0x278] sm:$0xff] }
 0x149   :  { %1231 = vmatpush2.msra.mxu1 %v573_v36  ;;  %1161 = vmatprep.subr.mxu0 %v442_v37  ;;  %v1274_v28 = vld [vmem:[#allocation8 + $0x68] sm:$0xff]  ;;  %v1273_v30 = vld [vmem:[#allocation8 + $0x60] sm:$0xff]  ;;  %v1339_v31 = vld [vmem:[#allocation8 + $0x270] sm:$0xff] }
 0x14a   :  { %1232 = vmatprep.subr.mxu1 %v570_v38  ;;  %1162 = vmatpush2.msra.mxu0 %v441_v39  ;;  %v1272_v32 = vld [vmem:[#allocation8 + $0x58] sm:$0xff]  ;;  %v1338_v33 = vld [vmem:[#allocation8 + $0x268] sm:$0xff]  ;;  %v1271_v34 = vld [vmem:[#allocation8 + $0x50] sm:$0xff] }
 0x14b   :  { %1233 = vmatpush2.msra.mxu1 %v569_v40  ;;  %1163 = vmatprep.subr.mxu0 %v438_v42  ;;  %v1337_v35 = vld [vmem:[#allocation8 + $0x260] sm:$0xff]  ;;  %v1270_v36 = vld [vmem:[#allocation8 + $0x48] sm:$0xff]  ;;  %v1336_v37 = vld [vmem:[#allocation8 + $0x258] sm:$0xff] }
 0x14c   :  { %1234 = vmatprep.subr.mxu1 %v566_v43  ;;  %1164 = vmatpush2.msra.mxu0 %v437_v44  ;;  %v1269_v38 = vld [vmem:[#allocation8 + $0x40] sm:$0xff]  ;;  %v1335_v39 = vld [vmem:[#allocation8 + $0x250] sm:$0xff]  ;;  %v1268_v40 = vld [vmem:[#allocation8 + $0x38] sm:$0xff] }
 0x14d   :  { %1235 = vmatpush2.msra.mxu1 %v565_v45  ;;  %1165 = vmatprep.subr.mxu0 %v434_v46  ;;  %v1334_v42 = vld [vmem:[#allocation8 + $0x248] sm:$0xff]  ;;  %v1267_v43 = vld [vmem:[#allocation8 + $0x30] sm:$0xff]  ;;  %v1333_v44 = vld [vmem:[#allocation8 + $0x240] sm:$0xff] }
 0x14e   :  { %1236 = vmatprep.subr.mxu1 %v562_v47  ;;  %1166 = vmatpush2.msra.mxu0 %v433_v48  ;;  %v1266_v45 = vld [vmem:[#allocation8 + $0x28] sm:$0xff]  ;;  %v1332_v46 = vld [vmem:[#allocation8 + $0x238] sm:$0xff]  ;;  %v1265_v47 = vld [vmem:[#allocation8 + $0x20] sm:$0xff] }
 0x14f   :  { %1237 = vmatpush2.msra.mxu1 %v561_v49  ;;  %1167 = vmatprep.subr.mxu0 %v430_v50  ;;  %v1331_v48 = vld [vmem:[#allocation8 + $0x230] sm:$0xff]  ;;  %v1264_v49 = vld [vmem:[#allocation8 + $0x18] sm:$0xff]  ;;  %v1330_v50 = vld [vmem:[#allocation8 + $0x228] sm:$0xff] }
 0x150   :  { %1238 = vmatprep.subr.mxu1 %v558_v51  ;;  %1168 = vmatpush2.msra.mxu0 %v429_v53  ;;  %v1263_v51 = vld [vmem:[#allocation8 + $0x10] sm:$0xff]  ;;  %v1329_v53 = vld [vmem:[#allocation8 + $0x220] sm:$0xff] }
 0x151   :  { %1239 = vmatpush2.msra.mxu1 %v557_v54  ;;  %1169 = vmatprep.subr.mxu0 %v426_v55  ;;  %v1262_v54 = vld [vmem:[#allocation8 + $0x8] sm:$0xff]  ;;  %v1328_v55 = vld [vmem:[#allocation8 + $0x218] sm:$0xff] }
 0x152   :  { %1240 = vmatprep.subr.mxu1 %v554_v56  ;;  %1170 = vmatpush2.msra.mxu0 %v425_v57  ;;  %v1261_v56 = vld [vmem:[#allocation8] sm:$0xff]  ;;  %v1327_v57 = vld [vmem:[#allocation8 + $0x210] sm:$0xff] }
 0x153   :  { %1171 = vmatprep.mubr.f32.mxu0 %v1979_v26  ;;  %1241 = vmatpush2.msra.mxu1 %v553_v8  ;;  %v1353_v26 = vld [vmem:[#allocation8 + $0x2e0] sm:$0xff]  ;;  %v1324_v8 = vld [vmem:[#allocation8 + $0x1f8] sm:$0xff] }
 0x154   :  { %1242 = vmatprep.mubr.f32.mxu1 %v1983_v52  ;;  %1172 = vmatmul.mubr.f32.vlgmr.msra.gmra.mxu0 %v1972_v16  ;;  %v1352_v52 = vld [vmem:[#allocation8 + $0x2d8] sm:$0xff]  ;;  %v1285_v16 = vld [vmem:[#allocation8 + $0xc0] sm:$0xff] }
 0x155   :  { %1243 = vmatmul.mubr.f32.vlgmr.msra.gmra.mxu1 %v1975_v21  ;;  %1401 = vmatprep.subr.mxu0 %v1292_v58  ;;  %v1351_v21 = vld [vmem:[#allocation8 + $0x2d0] sm:$0xff]  ;;  %v1326_v58 = vld [vmem:[#allocation8 + $0x208] sm:$0xff] }
 0x156   :  { %1402 = vmatpush1.msra.mxu0 %v1291_v62  ;;  %1472 = vmatprep.subr.mxu1 %v1356_v61  ;;  %v1323_v62 = vld [vmem:[#allocation8 + $0x1f0] sm:$0xff]  ;;  %v1321_v61 = vld [vmem:[#allocation8 + $0x1e0] sm:$0xff] }
 0x157   :  { %1403 = vmatprep.subr.mxu0 %v1290_v59  ;;  %1473 = vmatpush1.msra.mxu1 %v1355_v3  ;;  %v1325_v59 = vld [vmem:[#allocation8 + $0x200] sm:$0xff]  ;;  %v1387_v3 = vld [vmem:[#allocation8 + $0x3f0] sm:$0xff] }
 0x158   :  { %1404 = vmatpush1.msra.mxu0 %v1289_v11  ;;  %1474 = vmatprep.subr.mxu1 %v1354_v63  ;;  %v1322_v11 = vld [vmem:[#allocation8 + $0x1e8] sm:$0xff]  ;;  %v1320_v63 = vld [vmem:[#allocation8 + $0x1d8] sm:$0xff] }
 0x159   :  { %1405 = vmatprep.subr.mxu0 %v1288_v60  ;;  %1475 = vmatpush1.msra.mxu1 %v1353_v26  ;;  %v1388_v60 = vld [vmem:[#allocation8 + $0x3f8] sm:$0xff]  ;;  %v1319_v26 = vld [vmem:[#allocation8 + $0x1d0] sm:$0xff] }
 0x15a   :  { %1406 = vmatpush1.msra.mxu0 %v1287_v0  ;;  %1476 = vmatprep.subr.mxu1 %v1352_v52  ;;  %v1386_v0 = vld [vmem:[#allocation8 + $0x3e8] sm:$0xff] }
 0x15b   :  { %1407 = vmatprep.subr.mxu0 %v1286_v1  ;;  %1477 = vmatpush1.msra.mxu1 %v1351_v21  ;;  %v1385_v1 = vld [vmem:[#allocation8 + $0x3e0] sm:$0xff]  ;;  %v1318_v52 = vld [vmem:[#allocation8 + $0x1c8] sm:$0xff] }
 0x15c   :  { %1408 = vmatpush1.msra.mxu0 %v1285_v16  ;;  %1478 = vmatprep.subr.mxu1 %v1350_v4  ;;  %v1384_v16 = vld [vmem:[#allocation8 + $0x3d8] sm:$0xff]  ;;  %v1317_v21 = vld [vmem:[#allocation8 + $0x1c0] sm:$0xff] }
 0x15d   :  { %1409 = vmatprep.subr.mxu0 %v1284_v2  ;;  %1479 = vmatpush1.msra.mxu1 %v1349_v6  ;;  %v1383_v2 = vld [vmem:[#allocation8 + $0x3d0] sm:$0xff]  ;;  %v1316_v4 = vld [vmem:[#allocation8 + $0x1b8] sm:$0xff] }
 0x15e   :  { %1410 = vmatpush1.msra.mxu0 %v1283_v5  ;;  %1480 = vmatprep.subr.mxu1 %v1348_v9  ;;  %v1382_v5 = vld [vmem:[#allocation8 + $0x3c8] sm:$0xff]  ;;  %v1315_v6 = vld [vmem:[#allocation8 + $0x1b0] sm:$0xff] }
 0x15f   :  { %1411 = vmatprep.subr.mxu0 %v1282_v7  ;;  %1481 = vmatpush1.msra.mxu1 %v1347_v12  ;;  %v1381_v7 = vld [vmem:[#allocation8 + $0x3c0] sm:$0xff]  ;;  %v1314_v9 = vld [vmem:[#allocation8 + $0x1a8] sm:$0xff] }
 0x160   :  { %1412 = vmatpush1.msra.mxu0 %v1281_v10  ;;  %1482 = vmatprep.subr.mxu1 %v1346_v14  ;;  %v1380_v10 = vld [vmem:[#allocation8 + $0x3b8] sm:$0xff]  ;;  %v1313_v12 = vld [vmem:[#allocation8 + $0x1a0] sm:$0xff] }
 0x161   :  { %1413 = vmatprep.subr.mxu0 %v1280_v13  ;;  %1483 = vmatpush1.msra.mxu1 %v1345_v17  ;;  %v1379_v13 = vld [vmem:[#allocation8 + $0x3b0] sm:$0xff]  ;;  %v1312_v14 = vld [vmem:[#allocation8 + $0x198] sm:$0xff] }
 0x162   :  { %1414 = vmatpush1.msra.mxu0 %v1279_v15  ;;  %1484 = vmatprep.subr.mxu1 %v1344_v19  ;;  %v1378_v15 = vld [vmem:[#allocation8 + $0x3a8] sm:$0xff]  ;;  %v1311_v17 = vld [vmem:[#allocation8 + $0x190] sm:$0xff] }
 0x163   :  { %1415 = vmatprep.subr.mxu0 %v1278_v18  ;;  %1485 = vmatpush1.msra.mxu1 %v1343_v22  ;;  %v1377_v18 = vld [vmem:[#allocation8 + $0x3a0] sm:$0xff]  ;;  %v1310_v19 = vld [vmem:[#allocation8 + $0x188] sm:$0xff] }
 0x164   :  { %1416 = vmatpush1.msra.mxu0 %v1277_v20  ;;  %1486 = vmatprep.subr.mxu1 %v1342_v24  ;;  %v1376_v20 = vld [vmem:[#allocation8 + $0x398] sm:$0xff]  ;;  %v1309_v22 = vld [vmem:[#allocation8 + $0x180] sm:$0xff]  ;;  %v619_v24 = vsub.s32 0, %v1948_v41 }
 0x165   :  { %1417 = vmatprep.subr.mxu0 %v1276_v23  ;;  %1487 = vmatpush1.msra.mxu1 %v1341_v27  ;;  %v1375_v23 = vld [vmem:[#allocation8 + $0x390] sm:$0xff]  ;;  %v1374_v27 = vld [vmem:[#allocation8 + $0x388] sm:$0xff] }
 0x166   :  { %1418 = vmatpush1.msra.mxu0 %v1275_v25  ;;  %1488 = vmatprep.subr.mxu1 %v1340_v29  ;;  %v1308_v25 = vld [vmem:[#allocation8 + $0x178] sm:$0xff]  ;;  %v1307_v29 = vld [vmem:[#allocation8 + $0x170] sm:$0xff] }
 0x167   :  { %1419 = vmatprep.subr.mxu0 %v1274_v28  ;;  %1489 = vmatpush1.msra.mxu1 %v1339_v31  ;;  %v1998_v28 = vld [vmem:[#allocation7] sm:$0xf]  ;;  %v623_v31 = vsub.s32 1, %v1948_v41 }
 0x168   :  { %1420 = vmatpush1.msra.mxu0 %v1273_v30  ;;  %1490 = vmatprep.subr.mxu1 %v1338_v33  ;;  %v1373_v30 = vld [vmem:[#allocation8 + $0x380] sm:$0xff]  ;;  %v1372_v33 = vld [vmem:[#allocation8 + $0x378] sm:$0xff] }
 0x169   :  { %1421 = vmatprep.subr.mxu0 %v1272_v32  ;;  %1491 = vmatpush1.msra.mxu1 %v1337_v35  ;;  %v1306_v32 = vld [vmem:[#allocation8 + $0x168] sm:$0xff]  ;;  %v1305_v35 = vld [vmem:[#allocation8 + $0x160] sm:$0xff] }
 0x16a   :  { %1422 = vmatpush1.msra.mxu0 %v1271_v34  ;;  %1492 = vmatprep.subr.mxu1 %v1336_v37  ;;  %v747_v34 = vpop.f32.mrf.mxu0  ;;  %v620_v37 = vrot.slane %v1998_v28, %v619_v24 }
 0x16b   :  { %1423 = vmatprep.subr.mxu0 %v1270_v36  ;;  %1493 = vmatpush1.msra.mxu1 %v1335_v39  ;;  %v1371_v36 = vld [vmem:[#allocation8 + $0x370] sm:$0xff]  ;;  %v1370_v39 = vld [vmem:[#allocation8 + $0x368] sm:$0xff] }
 0x16c   :  { %1424 = vmatpush1.msra.mxu0 %v1269_v38  ;;  %1494 = vmatprep.subr.mxu1 %v1334_v42  ;;  %v1304_v38 = vld [vmem:[#allocation8 + $0x158] sm:$0xff]  ;;  %v1369_v42 = vld [vmem:[#allocation8 + $0x360] sm:$0xff] }
 0x16d   :  { %1425 = vmatprep.subr.mxu0 %v1268_v40  ;;  %1495 = vmatpush1.msra.mxu1 %v1333_v44  ;;  %v1303_v40 = vld [vmem:[#allocation8 + $0x150] sm:$0xff]  ;;  %v1302_v44 = vld [vmem:[#allocation8 + $0x148] sm:$0xff] }
 0x16e   :  { %1426 = vmatpush1.msra.mxu0 %v1267_v43  ;;  %1496 = vmatprep.subr.mxu1 %v1332_v46  ;;  %v624_v43 = vrot.slane %v1998_v28, %v623_v31  ;;  %v818_v46 = vpop.f32.mrf.mxu1 }
 0x16f   :  { %1427 = vmatprep.subr.mxu0 %v1266_v45  ;;  %1497 = vmatpush1.msra.mxu1 %v1331_v48  ;;  %v1368_v45 = vld [vmem:[#allocation8 + $0x358] sm:$0xff]  ;;  %v1301_v48 = vld [vmem:[#allocation8 + $0x140] sm:$0xff] }
 0x170   :  { %1428 = vmatpush1.msra.mxu0 %v1265_v47  ;;  %1498 = vmatprep.subr.mxu1 %v1330_v50  ;;  %v749_v47 = vpop.f32.mrf.mxu0  ;;  %v1300_v50 = vld [vmem:[#allocation8 + $0x138] sm:$0xff] }
 0x171   :  { %1429 = vmatprep.subr.mxu0 %v1264_v49  ;;  %1499 = vmatpush1.msra.mxu1 %v1329_v53  ;;  %v748_v49 = vadd.f32 %v747_v34, %v620_v37  ;;  %v750_v53 = vadd.f32 %v749_v47, %v624_v43  ;;  %v1575_v34 = vld [vmem:[%s2119_s5 + $0xd0] sm:$0xff]  ;;  %v1558_v37 = vld [vmem:[%s2119_s5 + $0x48] sm:$0xff]  ;;  %v1569_v47 = vld [vmem:[%s2119_s5 + $0xa0] sm:$0xff] }
 0x172   :  { %1430 = vmatpush1.msra.mxu0 %v1263_v51  ;;  %1500 = vmatprep.subr.mxu1 %v1328_v55  ;;  %v1299_v51 = vld [vmem:[#allocation8 + $0x130] sm:$0xff]  ;;  %v820_v55 = vpop.f32.mrf.mxu1  ;;  %v1571_v43 = vld [vmem:[%s2119_s5 + $0xb0] sm:$0xff] }
 0x173   :  { %1431 = vmatprep.subr.mxu0 %v1262_v54  ;;  %1501 = vmatpush1.msra.mxu1 %v1327_v57  ;;  %v1298_v54 = vld [vmem:[#allocation8 + $0x128] sm:$0xff]  ;;  %v819_v57 = vadd.f32 %v818_v46, %v748_v49  ;;  %v1554_v46 = vld [vmem:[%s2119_s5 + $0x28] sm:$0xff]  ;;  %v631_v49 = vsub.s32 3, %v1948_v41 }
 0x174   :  { %1432 = vmatpush1.msra.mxu0 %v1261_v56  ;;  %1502 = vmatprep.subr.mxu1 %v1326_v58  ;;  %v1297_v56 = vld [vmem:[#allocation8 + $0x120] sm:$0xff] }
 0x175   :  { %1433 = vmatprep.subr.mxu0 %v1324_v8  ;;  %1503 = vmatpush1.msra.mxu1 %v1325_v59  ;;  %v1296_v8 = vld [vmem:[#allocation8 + $0x118] sm:$0xff]  ;;  %v821_v59 = vadd.f32 %v820_v55, %v750_v53  ;;  %v632_v53 = vrot.slane %v1998_v28, %v631_v49 }
 0x176   :  { %1434 = vmatpush2.msra.mxu0 %v1323_v62  ;;  %1504 = vmatprep.subr.mxu1 %v1388_v60  ;;  %v1295_v62 = vld [vmem:[#allocation8 + $0x110] sm:$0xff]  ;;  %v1294_v60 = vld [vmem:[#allocation8 + $0x108] sm:$0xff] }
 0x177   :  { %1435 = vmatprep.subr.mxu0 %v1322_v11  ;;  %1505 = vmatpush2.msra.mxu1 %v1387_v3 }
 0x178   :  { %1436 = vmatpush2.msra.mxu0 %v1321_v61  ;;  %1506 = vmatprep.subr.mxu1 %v1386_v0 }
 0x179   :  { %1437 = vmatprep.subr.mxu0 %v1320_v63  ;;  %1507 = vmatpush2.msra.mxu1 %v1385_v1  ;;  %v1293_v63 = vld [vmem:[#allocation8 + $0x100] sm:$0xff] }
 0x17a   :  { %1438 = vmatpush2.msra.mxu0 %v1319_v26  ;;  %1508 = vmatprep.subr.mxu1 %v1384_v16 }
 0x17b   :  { %1439 = vmatprep.subr.mxu0 %v1318_v52  ;;  %1509 = vmatpush2.msra.mxu1 %v1383_v2  ;;  %v1367_v52 = vld [vmem:[#allocation8 + $0x350] sm:$0xff] }
 0x17c   :  { %1440 = vmatpush2.msra.mxu0 %v1317_v21  ;;  %1510 = vmatprep.subr.mxu1 %v1382_v5  ;;  %v1366_v21 = vld [vmem:[#allocation8 + $0x348] sm:$0xff] }
 0x17d   :  { %1441 = vmatprep.subr.mxu0 %v1316_v4  ;;  %1511 = vmatpush2.msra.mxu1 %v1381_v7  ;;  %v1365_v4 = vld [vmem:[#allocation8 + $0x340] sm:$0xff]  ;;  %v1363_v7 = vld [vmem:[#allocation8 + $0x330] sm:$0xff] }
 0x17e   :  { %1442 = vmatpush2.msra.mxu0 %v1315_v6  ;;  %1512 = vmatprep.subr.mxu1 %v1380_v10  ;;  %v1364_v6 = vld [vmem:[#allocation8 + $0x338] sm:$0xff]  ;;  %v1362_v10 = vld [vmem:[#allocation8 + $0x328] sm:$0xff] }
 0x17f   :  { %1443 = vmatprep.subr.mxu0 %v1314_v9  ;;  %1513 = vmatpush2.msra.mxu1 %v1379_v13  ;;  %v1361_v13 = vld [vmem:[#allocation8 + $0x320] sm:$0xff] }
 0x180   :  { %1444 = vmatpush2.msra.mxu0 %v1313_v12  ;;  %1514 = vmatprep.subr.mxu1 %v1378_v15  ;;  %v1359_v15 = vld [vmem:[#allocation8 + $0x310] sm:$0xff] }
 0x181   :  { %1445 = vmatprep.subr.mxu0 %v1312_v14  ;;  %1515 = vmatpush2.msra.mxu1 %v1377_v18  ;;  %v1360_v14 = vld [vmem:[#allocation8 + $0x318] sm:$0xff]  ;;  %v1357_v18 = vld [vmem:[#allocation8 + $0x300] sm:$0xff] }
 0x182   :  { %1446 = vmatpush2.msra.mxu0 %v1311_v17  ;;  %1516 = vmatprep.subr.mxu1 %v1376_v20  ;;  %v1358_v17 = vld [vmem:[#allocation8 + $0x308] sm:$0xff] }
 0x183   :  { %1447 = vmatprep.subr.mxu0 %v1310_v19  ;;  %1517 = vmatpush2.msra.mxu1 %v1375_v23  ;;  %v1580_v19 = vld [vmem:[%s2119_s5 + $0xf8] sm:$0xff]  ;;  %v1563_v23 = vld [vmem:[%s2119_s5 + $0x70] sm:$0xff] }
 0x184   :  { %1448 = vmatpush2.msra.mxu0 %v1309_v22  ;;  %1518 = vmatprep.subr.mxu1 %v1374_v27  ;;  %v1564_v20 = vld [vmem:[%s2119_s5 + $0x78] sm:$0xff]  ;;  %v1579_v22 = vld [vmem:[%s2119_s5 + $0xf0] sm:$0xff]  ;;  %v1562_v27 = vld [vmem:[%s2119_s5 + $0x68] sm:$0xff] }
 0x185   :  { %1449 = vmatprep.subr.mxu0 %v1308_v25  ;;  %1519 = vmatpush2.msra.mxu1 %v1373_v30  ;;  %v1578_v25 = vld [vmem:[%s2119_s5 + $0xe8] sm:$0xff]  ;;  %v1561_v30 = vld [vmem:[%s2119_s5 + $0x60] sm:$0xff] }
 0x186   :  { %1450 = vmatpush2.msra.mxu0 %v1307_v29  ;;  %1520 = vmatprep.subr.mxu1 %v1372_v33  ;;  %v1577_v29 = vld [vmem:[%s2119_s5 + $0xe0] sm:$0xff]  ;;  %v1560_v33 = vld [vmem:[%s2119_s5 + $0x58] sm:$0xff] }
 0x187   :  { %1451 = vmatprep.subr.mxu0 %v1306_v32  ;;  %1521 = vmatpush2.msra.mxu1 %v1371_v36  ;;  %v1576_v32 = vld [vmem:[%s2119_s5 + $0xd8] sm:$0xff]  ;;  %v1574_v36 = vld [vmem:[%s2119_s5 + $0xc8] sm:$0xff] }
 0x188   :  { %1452 = vmatpush2.msra.mxu0 %v1305_v35  ;;  %1522 = vmatprep.subr.mxu1 %v1370_v39  ;;  %v1559_v35 = vld [vmem:[%s2119_s5 + $0x50] sm:$0xff]  ;;  %v1557_v39 = vld [vmem:[%s2119_s5 + $0x40] sm:$0xff] }
 0x189   :  { %1453 = vmatprep.subr.mxu0 %v1304_v38  ;;  %1523 = vmatpush2.msra.mxu1 %v1369_v42  ;;  %v1573_v38 = vld [vmem:[%s2119_s5 + $0xc0] sm:$0xff]  ;;  %v1556_v42 = vld [vmem:[%s2119_s5 + $0x38] sm:$0xff] }
 0x18a   :  { %1454 = vmatpush2.msra.mxu0 %v1303_v40  ;;  %1524 = vmatprep.subr.mxu1 %v1368_v45  ;;  %v1572_v40 = vld [vmem:[%s2119_s5 + $0xb8] sm:$0xff]  ;;  %v1570_v45 = vld [vmem:[%s2119_s5 + $0xa8] sm:$0xff] }
 0x18b   :  { %1455 = vmatprep.subr.mxu0 %v1302_v44  ;;  %1525 = vmatpush2.msra.mxu1 %v1367_v52  ;;  %v1555_v44 = vld [vmem:[%s2119_s5 + $0x30] sm:$0xff] }
 0x18c   :  { %1456 = vmatpush2.msra.mxu0 %v1301_v48  ;;  %1526 = vmatprep.subr.mxu1 %v1366_v21  ;;  %v627_v48 = vsub.s32 2, %v1948_v41  ;;  %v1553_v21 = vld [vmem:[%s2119_s5 + $0x20] sm:$0xff] }
 0x18d   :  { %1457 = vmatprep.subr.mxu0 %v1300_v50  ;;  %1527 = vmatpush2.msra.mxu1 %v1365_v4  ;;  %v1552_v4 = vld [vmem:[%s2119_s5 + $0x18] sm:$0xff] }
 0x18e   :  { %1458 = vmatpush2.msra.mxu0 %v1299_v51  ;;  %1528 = vmatprep.subr.mxu1 %v1364_v6  ;;  %v628_v51 = vrot.slane %v1998_v28, %v627_v48  ;;  %v1551_v6 = vld [vmem:[%s2119_s5 + $0x10] sm:$0xff] }
 0x18f   :  { %1459 = vmatprep.subr.mxu0 %v1298_v54  ;;  %1529 = vmatpush2.msra.mxu1 %v1363_v7  ;;  %v1566_v7 = vld [vmem:[%s2119_s5 + $0x88] sm:$0xff] }
 0x190   :  { %v889_v58 = vpop.f32.mrf.mxu0  ;;  %1460 = vmatpush2.msra.mxu0 %v1297_v56  ;;  %1530 = vmatprep.subr.mxu1 %v1362_v10  ;;  %v1565_v10 = vld [vmem:[%s2119_s5 + $0x80] sm:$0xff] }
 0x191   :  { %v890_v11 = vadd.f32 %v889_v58, %v819_v57  ;;  %1461 = vmatprep.subr.mxu0 %v1296_v8  ;;  %1531 = vmatpush2.msra.mxu1 %v1361_v13  ;;  %v1389_v13 = vld [vmem:[#allocation10] sm:$0x3] }
 0x192   :  { %v960_v61 = vpop.f32.mrf.mxu1  ;;  %v891_v3 = vpop.f32.mrf.mxu0  ;;  %1462 = vmatpush2.msra.mxu0 %v1295_v62  ;;  %1532 = vmatprep.subr.mxu1 %v1360_v14 }
 0x193   :  { %v961_v0 = vadd.f32 %v960_v61, %v890_v11  ;;  %v892_v26 = vadd.f32 %v891_v3, %v821_v59  ;;  %1463 = vmatprep.subr.mxu0 %v1294_v60  ;;  %1533 = vmatpush2.msra.mxu1 %v1359_v15  ;;  %v1394_v15 = vrot.slane %v1389_v13, %v619_v24  ;;  %v1678_v24 = vld [vmem:[#allocation11] ss:$0 sm:$0xff] }
 0x194   :  { %v962_v1 = vpop.f32.mrf.mxu1  ;;  %1464 = vmatpush2.msra.mxu0 %v1293_v63  ;;  %1534 = vmatprep.subr.mxu1 %v1358_v17  ;;  %v1398_v17 = vrot.slane %v1389_v13, %v623_v31 }
 0x195   :  { %v963_v16 = vadd.f32 %v962_v1, %v892_v26  ;;  %v1253_v2 = vmul.f32 0.01, %v961_v0  ;;  %vm1249_vm0 = vcmp.ge.f32.partialorder %v961_v0, 0.0  ;;  %1535 = vmatpush2.msra.mxu1 %v1357_v18  ;;  %1679 = vmatprep.subr.mxu0 %v1580_v19 }
 0x197   :  { %v1254_v5 = vmul.f32 0.01, %v963_v16  ;;  %vm1250_vm1 = vcmp.ge.f32.partialorder %v963_v16, 0.0  ;;  %v1257_v12 = vsel %vm1249_vm0, %v961_v0, %v1253_v2  ;;  %v1568_v2 = vld [vmem:[%s2119_s5 + $0x98] sm:$0xff] }
 0x199   :  { %v1258_v9 = vsel %vm1250_vm1, %v963_v16, %v1254_v5  ;;  %v1567_v5 = vld [vmem:[%s2119_s5 + $0x90] sm:$0xff] }
 0x19a   :  { %1465 = vmatprep.mubr.f32.mxu0 %v1258_v9  ;;  %v1550_v9 = vld [vmem:[%s2119_s5 + $0x8] sm:$0xff] }
 0x19b   :  { %1466 = vmatmul.mubr.f32.vlgmr.msra.gmra.mxu0 %v1257_v12  ;;  %v1549_v12 = vld [vmem:[%s2119_s5] sm:$0xff]  ;;  %s1889_s5 = smov [#allocation13]  }
 0x19c   :  { %1680 = vmatpush3.msra.mxu0 %v1564_v20  ;;  %s1666_s13 = sshll.u32 %s1889_s5, 4  ;;  %s1667_s13 = int_to_ptr.vmem [resolvable:$true] %s1666_s13 }
 0x19d   :  { %1681 = vmatprep.subr.mxu0 %v1579_v22  ;;  %s1848_s14 = scalar_lea.vmem %s1667_s13, 32  ;;  %p1853_p3 = scmp.lt.s32.totalorder %s1667_s13, %s1667_s13 }
 0x19e   :  { %1682 = vmatpush3.msra.mxu0 %v1563_v23  ;;  %p1849_p2 = scmp.ne.s32.totalorder %s1667_s13, %s1848_s14  ;;  %p1854_p4 = scmp.lt.s32.totalorder %s1848_s14, %s1848_s14 }
 0x19f   :  { %1683 = vmatprep.subr.mxu0 %v1578_v25 }
 0x1a0   :  { %1684 = vmatpush3.msra.mxu0 %v1562_v27  ;;  %p1855_p5 = por %p1854_p4, %p1853_p3 }
 0x1a1   :  { %1685 = vmatprep.subr.mxu0 %v1577_v29 }
 0x1a2   :  { %1686 = vmatpush3.msra.mxu0 %v1561_v30  ;;  %p1856_p6 = pnand %p1855_p5, %p1849_p2 }
 0x1a3   :  { %1687 = vmatprep.subr.mxu0 %v1576_v32 }
 0x1a4   :  { %1688 = vmatpush3.msra.mxu0 %v1560_v33 }
 0x1a5   :  { %1689 = vmatprep.subr.mxu0 %v1575_v34 }
 0x1a6   :  { %1690 = vmatpush3.msra.mxu0 %v1559_v35 }
 0x1a7   :  { %1691 = vmatprep.subr.mxu0 %v1574_v36 }
 0x1a8   :  { %1692 = vmatpush3.msra.mxu0 %v1558_v37 }
 0x1a9   :  { %1693 = vmatprep.subr.mxu0 %v1573_v38 }
 0x1aa   :  { %1694 = vmatpush3.msra.mxu0 %v1557_v39 }
 0x1ab   :  { %1695 = vmatprep.subr.mxu0 %v1572_v40 }
 0x1ac   :  { %1696 = vmatpush3.msra.mxu0 %v1556_v42 }
 0x1ad   :  { %1697 = vmatprep.subr.mxu0 %v1571_v43 }
 0x1ae   :  { %1698 = vmatpush3.msra.mxu0 %v1555_v44 }
 0x1af   :  { %1699 = vmatprep.subr.mxu0 %v1570_v45 }
 0x1b0   :  { %1700 = vmatpush3.msra.mxu0 %v1554_v46 }
 0x1b1   :  { %1701 = vmatprep.subr.mxu0 %v1569_v47 }
 0x1b2   :  { %1702 = vmatpush3.msra.mxu0 %v1553_v21 }
 0x1b3   :  { %1703 = vmatprep.subr.mxu0 %v1568_v2 }
 0x1b4   :  { %1704 = vmatpush3.msra.mxu0 %v1552_v4 }
 0x1b5   :  { %1705 = vmatprep.subr.mxu0 %v1567_v5 }
 0x1b6   :  { %1706 = vmatpush3.msra.mxu0 %v1551_v6 }
 0x1b7   :  { %1707 = vmatprep.subr.mxu0 %v1566_v7 }
 0x1b8   :  { %1708 = vmatpush3.msra.mxu0 %v1550_v9 }
 0x1b9   :  { %1709 = vmatprep.subr.mxu0 %v1565_v10 }
 0x1ba   :  { %1710 = vmatpush3.msra.mxu0 %v1549_v12 }
 0x1d2   :  { %v1031_v50 = vpop.f32.mrf.mxu0 }
 0x1d3   :  { %v1032_v56 = vadd.f32 %v1031_v50, %v628_v51 }
 0x1d4   :  { %v1102_v54 = vpop.f32.mrf.mxu1  ;;  %v1033_v55 = vpop.f32.mrf.mxu0 }
 0x1d5   :  { %v1034_v57 = vadd.f32 %v1033_v55, %v632_v53  ;;  %v1103_v58 = vadd.f32 %v1102_v54, %v1032_v56 }
 0x1d6   :  { %v1104_v8 = vpop.f32.mrf.mxu1 }
 0x1d7   :  { %v1105_v11 = vadd.f32 %v1104_v8, %v1034_v57 }
 0x214   :  { %v1173_v62 = vpop.f32.mrf.mxu0 }
 0x215   :  { %v1244_v59 = vpop.f32.mrf.mxu1  ;;  %v1174_v60 = vadd.f32 %v1173_v62, %v1103_v58 }
 0x216   :  { %v1175_v61 = vpop.f32.mrf.mxu0 }
 0x217   :  { %v1245_v3 = vadd.f32 %v1244_v59, %v1174_v60  ;;  %v1176_v63 = vadd.f32 %v1175_v61, %v1105_v11  ;;  %v1246_v0 = vpop.f32.mrf.mxu1 }
 0x219   :  { %v1247_v26 = vadd.f32 %v1246_v0, %v1176_v63  ;;  %v1255_v1 = vmul.f32 0.01, %v1245_v3  ;;  %vm1251_vm2 = vcmp.ge.f32.partialorder %v1245_v3, 0.0 }
 0x21b   :  { %v1256_v52 = vmul.f32 0.01, %v1247_v26  ;;  %vm1252_vm3 = vcmp.ge.f32.partialorder %v1247_v26, 0.0  ;;  %v1259_v16 = vsel %vm1251_vm2, %v1245_v3, %v1255_v1 }
 0x21d   :  { %v1260_v28 = vsel %vm1252_vm3, %v1247_v26, %v1256_v52 }
 0x21e   :  { %1536 = vmatprep.mubr.f32.mxu1 %v1260_v28 }
 0x21f   :  { %1537 = vmatmul.mubr.f32.vlgmr.msra.gmra.mxu1 %v1259_v16 }
 0x25b   :  { %v1467_v14 = vpop.f32.mrf.mxu0 }
 0x25c   :  { %v1468_v19 = vadd.f32 %v1467_v14, %v1394_v15 }
 0x25d   :  { %v1469_v18 = vpop.f32.mrf.mxu0 }
 0x25e   :  { %v1470_v22 = vadd.f32 %v1469_v18, %v1398_v17 }
 0x2df   :  { %v1538_v20 = vpop.f32.mrf.mxu1 }
 0x2e0   :  { %v1539_v23 = vadd.f32 %v1538_v20, %v1468_v19 }
 0x2e1   :  { %v1540_v25 = vpop.f32.mrf.mxu1 }
 0x2e2   :  { %v1541_v27 = vadd.f32 %v1540_v25, %v1470_v22  ;;  %v1545_v29 = vmul.f32 0.01, %v1539_v23  ;;  %vm1543_vm4 = vcmp.ge.f32.partialorder %v1539_v23, 0.0 }
 0x2e4   :  { %v1546_v30 = vmul.f32 0.01, %v1541_v27  ;;  %vm1544_vm5 = vcmp.ge.f32.partialorder %v1541_v27, 0.0  ;;  %v1547_v33 = vsel %vm1543_vm4, %v1539_v23, %v1545_v29 }
 0x2e6   :  { %v1548_v32 = vsel %vm1544_vm5, %v1541_v27, %v1546_v30 }
 0x2e7   :  { %1652 = vmatprep.mubr.f32.mxu0 %v1548_v32 }
 0x2e8   :  { %1653 = vmatmul.mubr.f32.vlgmr.msra.gmra.mxu0 %v1547_v33 }
 0x3a8   :  { %v1711_v34 = vpop.f32.mrf.mxu0 }
 0x3aa   :  { %v1712_v35 = vpop.f32.mrf.mxu0 }
 0x3ab   :  { %v1713_v41 = vadd.f32 %v1712_v35, %v1711_v34 }
 0x3ad   :  { %v1655_v31 = vadd.f32 %v1713_v41, %v1678_v24 }
 0x3af   :  { %1659 = vst.msk [vmem:[#allocation13] sm:$0x3] %vm1658_vm6, %v1655_v31 }
 0x3b0   :  { %1859 = shalt.err (!%p1856_p6)
}
 0x3b1   :  { %1669 = dma.vmem_to_hbm [thread:$0]  %s1667_s13, 32, %s2121_s7, [#allocation4]  }
 0x3b2   :  { %1876 = dma.done.wait [#allocation4], 32  }
 0x3b3   :  { %1877 = vsyncadd [#allocation4], 4294967264 }
 0x3b4   :  { %1673 = vsyncpa [#allocation3], 1 }
 0x3b5   :  { %1674 = vsyncpa [#allocation6], 1 }
 0x3b6   :  { %1675 = vsyncpa [#allocation9], 1 }
 0x3b7   :  { %1676 = vsyncpa [#allocation12], 1 }
 0x3b8   :  { %1677 = vsyncpa [#allocation4], 1 }

</bundles_post_ra>
